<compile_context>
chip_gen: v6e
topology: v6e:2x2x1
jax: 0.10.0
libtpu: 0.0.40
codegen_flags: <defaults>
</compile_context>

<pallas_src>
import jax
import jax.numpy as jnp
from jax.experimental import pallas as pl
from jax.experimental.pallas import tpu as pltpu

D_MODEL = 30          # model width of the PyTorch module
D_IN_PAD = 32         # HBM-facing lane pad of x (last dim == full array dim -> legal block)
D_PAD = 128           # lane-dense padded width for output / second matmul N
D_FF = 1024
LN_EPS = 1e-5         # torch.nn.LayerNorm default


def ffn_layernorm_kernel(x_ref, w1_ref, w2_ref, o_ref, xext_ref):
    # x_ref   : (tm, D_IN_PAD)   f32   (lanes >= D_MODEL are zero)
    # w1_ref  : (D_IN_PAD, D_FF) bf16  (rows  >= D_MODEL are zero)
    # w2_ref  : (D_FF, D_PAD)    bf16  (cols  >= D_MODEL are zero)
    # o_ref   : (tm, D_PAD)      f32   (only lanes < D_MODEL meaningful; sliced outside)
    # xext_ref: (tm, D_PAD)      f32   VMEM scratch for the 32 -> 128 residual extension
    x = x_ref[...]  # keep f32 copy for residual / LayerNorm precision

    # fc[0]: Linear(d_model -> d_ff, bias=False) + ReLU (bf16 MXU operands, f32 accumulate).
    h = jnp.dot(x.astype(jnp.bfloat16), w1_ref[...],
                preferred_element_type=jnp.float32)
    h = jnp.maximum(h, 0.0).astype(jnp.bfloat16)   # fused ReLU + downcast of largest temp

    # fc[2]: Linear(d_ff -> d_model, bias=False)
    y = jnp.dot(h, w2_ref[...], preferred_element_type=jnp.float32)   # (tm, D_PAD)

    # Residual: zero-extend x from 32 -> 128 lanes through the scratch (padded lanes of x,
    # W1-rows and W2-cols are exactly zero, so z is exactly zero beyond lane D_MODEL-1).
    xext_ref[...] = jnp.zeros_like(xext_ref)
    xext_ref[:, :D_IN_PAD] = x
    z = y + xext_ref[...]

    # LayerNorm(d_model): fresh nn.LayerNorm => gamma=1, beta=0, biased variance, eps=1e-5.
    # Padded lanes contribute exactly 0 to the sums, so full-lane sums / D_MODEL are the
    # correct masked statistics; var = E[z^2] - mean^2 is clamped at 0 (f32 cancellation).
    inv_d = jnp.float32(1.0 / D_MODEL)
    mean = jnp.sum(z, axis=-1, keepdims=True) * inv_d
    ex2 = jnp.sum(z * z, axis=-1, keepdims=True) * inv_d
    var = jnp.maximum(ex2 - mean * mean, 0.0)
    o_ref[...] = ((z - mean) * jax.lax.rsqrt(var + LN_EPS)).astype(o_ref.dtype)


def prepare_weights(w1, w2):
    """Pad + cast the weights once at parameter-prep time (hoisted out of the call path)."""
    assert w1.shape == (D_MODEL, D_FF) and w2.shape == (D_FF, D_MODEL)
    w1_pad = jnp.zeros((D_IN_PAD, D_FF), jnp.bfloat16).at[:D_MODEL, :].set(
        w1.astype(jnp.bfloat16))
    w2_pad = jnp.zeros((D_FF, D_PAD), jnp.bfloat16).at[:, :D_MODEL].set(
        w2.astype(jnp.bfloat16))
    return w1_pad, w2_pad


def _pick_tm(n_rows, tm_max=2048):
    """Row tile: big enough to amortize ~0.35us/step pipeline overhead, but keep >= 2 grid
    steps whenever possible so the parallel axis can shard across both v7x TensorCores."""
    n128 = 128 * pl.cdiv(n_rows, 128)
    if n128 >= 256:
        return max(128, min(tm_max, 128 * (n128 // 256)))
    return 128


def poswise_feed_forward_net(inputs, w1_pad, w2_pad, *, tm_max=2048):
    """inputs: [batch, seq, d_model]; w1_pad/w2_pad produced once by prepare_weights()."""
    b, s, d = inputs.shape
    assert d == D_MODEL
    assert w1_pad.shape == (D_IN_PAD, D_FF) and w1_pad.dtype == jnp.bfloat16
    assert w2_pad.shape == (D_FF, D_PAD) and w2_pad.dtype == jnp.bfloat16
    n = b * s

    tm = _pick_tm(n, tm_max)
    n_pad = tm * pl.cdiv(n, tm)

    # Cheap HBM-facing pad: rows -> n_pad, lanes 30 -> 32 (zeros keep the masked-LN trick valid).
    x2d = inputs.reshape(n, d).astype(jnp.float32)
    x_pad = jnp.pad(x2d, ((0, n_pad - n), (0, D_IN_PAD - d)))

    out_pad = pl.pallas_call(
        ffn_layernorm_kernel,
        out_shape=jax.ShapeDtypeStruct((n_pad, D_PAD), jnp.float32),
        grid_spec=pltpu.PrefetchScalarGridSpec(
            num_scalar_prefetch=0,
            grid=(n_pad // tm,),
            in_specs=[
                pl.BlockSpec((tm, D_IN_PAD), lambda i: (i, 0)),    # row tile of x (32 lanes)
                pl.BlockSpec((D_IN_PAD, D_FF), lambda i: (0, 0)),  # full W1, fetched once
                pl.BlockSpec((D_FF, D_PAD), lambda i: (0, 0)),     # full W2, fetched once
            ],
            out_specs=pl.BlockSpec((tm, D_PAD), lambda i: (i, 0)),
            scratch_shapes=[pltpu.VMEM((tm, D_PAD), jnp.float32)],
        ),
        compiler_params=pltpu.CompilerParams(
            dimension_semantics=("parallel",),
            vmem_limit_bytes=40 * 1024 * 1024,
        ),
    )(x_pad, w1_pad, w2_pad)

    return out_pad[:n, :D_MODEL].reshape(b, s, d).astype(inputs.dtype)


def reference(inputs, w1, w2, *, bf16_matmul=True):
    """Pure-JAX reference. bf16_matmul=True mimics the kernel's MXU numerics."""
    x = inputs.astype(jnp.float32)
    if bf16_matmul:
        a, b1, b2 = x.astype(jnp.bfloat16), w1.astype(jnp.bfloat16), w2.astype(jnp.bfloat16)
    else:
        a, b1, b2 = x, w1.astype(jnp.float32), w2.astype(jnp.float32)
    h = jnp.maximum(
        jnp.einsum("bsd,df->bsf", a, b1, preferred_element_type=jnp.float32), 0.0)
    if bf16_matmul:
        h = h.astype(jnp.bfloat16)
    y = jnp.einsum("bsf,fd->bsd", h, b2, preferred_element_type=jnp.float32)
    z = y + x
    mean = jnp.mean(z, axis=-1, keepdims=True)
    var = jnp.mean((z - mean) ** 2, axis=-1, keepdims=True)
    return (z - mean) / jnp.sqrt(var + LN_EPS)


if __name__ == "__main__":
    key = jax.random.PRNGKey(0)
    k_x, k_w1, k_w2, k_x2 = jax.random.split(key, 4)

    # Deterministic parameter init (PyTorch Linear stores weight as [out, in];
    # we keep [in, out] so the kernel does x @ W directly).
    bound1 = 1.0 / (D_MODEL ** 0.5)
    bound2 = 1.0 / (D_FF ** 0.5)
    w1 = jax.random.uniform(k_w1, (D_MODEL, D_FF), jnp.float32, -bound1, bound1)
    w2 = jax.random.uniform(k_w2, (D_FF, D_MODEL), jnp.float32, -bound2, bound2)
    w1_pad, w2_pad = prepare_weights(w1, w2)   # hoisted: padded/cast once, not per call

    fwd = jax.jit(poswise_feed_forward_net)

    # Small shape (single grid step) and a medium shape (multi-step grid + row padding).
    for (batch, seq), kx in (((2, 8), k_x), ((4, 100), k_x2)):
        x = jax.random.normal(kx, (batch, seq, D_MODEL), dtype=jnp.float32)
        out = jax.block_until_ready(fwd(x, w1_pad, w2_pad))
        assert out.shape == (batch, seq, D_MODEL)
        # Tight check against a reference matching the kernel's bf16-MXU / f32-accum numerics.
        ref_bf16 = reference(x, w1, w2, bf16_matmul=True)
        assert jnp.allclose(out, ref_bf16, atol=2e-3, rtol=2e-3), "mismatch vs bf16 reference"
        # Loose sanity check against the full-f32 PyTorch-equivalent math.
        ref_f32 = reference(x, w1, w2, bf16_matmul=False)
        assert jnp.allclose(out, ref_f32, atol=1e-1, rtol=1e-1), "mismatch vs f32 reference"

    print("KERNEL_OK")
</pallas_src>

<mosaic_0001>
module attributes {stable_mosaic.version = 11 : i64} {
  func.func @ffn_layernorm_kernel(%arg0: i32, %arg1: memref<128x32xf32, #tpu.memory_space<vmem>>, %arg2: memref<32x1024xbf16, #tpu.memory_space<vmem>>, %arg3: memref<1024x128xbf16, #tpu.memory_space<vmem>>, %arg4: memref<128x128xf32, #tpu.memory_space<vmem>>, %arg5: memref<128x128xf32, #tpu.memory_space<vmem>>) attributes {dimension_semantics = [#tpu.dimension_semantics<parallel>], iteration_bounds = array<i64: 1>, scalar_prefetch = 0 : i64, scratch_operands = 1 : i64, tpu.core_type = #tpu.core_type<tc>, window_params = [{transform_indices = @transform_0, window_bounds = array<i64: 128, 32>}, {pipeline_mode = #tpu.pipeline_mode<synchronous>, transform_indices = @transform_1, window_bounds = array<i64: 32, 1024>}, {pipeline_mode = #tpu.pipeline_mode<synchronous>, transform_indices = @transform_2, window_bounds = array<i64: 1024, 128>}, {transform_indices = @transform_3, window_bounds = array<i64: 128, 128>}]} {
    %c0 = arith.constant 0 : index
    %c0_0 = arith.constant 0 : index
    %0 = vector.load %arg1[%c0, %c0_0] : memref<128x32xf32, #tpu.memory_space<vmem>>, vector<128x32xf32>
    %1 = arith.truncf %0 : vector<128x32xf32> to vector<128x32xbf16>
    %c0_1 = arith.constant 0 : index
    %c0_2 = arith.constant 0 : index
    %2 = vector.load %arg2[%c0_1, %c0_2] : memref<32x1024xbf16, #tpu.memory_space<vmem>>, vector<32x1024xbf16>
    %cst = arith.constant dense<0.000000e+00> : vector<128x1024xf32>
    %3 = tpu.matmul %1, %2, %cst {dimension_numbers = #tpu.dot_dimension_numbers<[1], [0], [0], [1], [0, 0, 1, 1], [], []>} : vector<128x32xbf16>, vector<32x1024xbf16>, vector<128x1024xf32> -> vector<128x1024xf32>
    %cst_3 = arith.constant 0.000000e+00 : f32
    %4 = vector.broadcast %cst_3 : f32 to vector<128x1024xf32>
    %5 = arith.maximumf %3, %4 : vector<128x1024xf32>
    %6 = arith.truncf %5 : vector<128x1024xf32> to vector<128x1024xbf16>
    %c0_4 = arith.constant 0 : index
    %c0_5 = arith.constant 0 : index
    %7 = vector.load %arg3[%c0_4, %c0_5] : memref<1024x128xbf16, #tpu.memory_space<vmem>>, vector<1024x128xbf16>
    %cst_6 = arith.constant dense<0.000000e+00> : vector<128x128xf32>
    %8 = tpu.matmul %6, %7, %cst_6 {dimension_numbers = #tpu.dot_dimension_numbers<[1], [0], [0], [1], [0, 0, 1, 1], [], []>} : vector<128x1024xbf16>, vector<1024x128xbf16>, vector<128x128xf32> -> vector<128x128xf32>
    %cst_7 = arith.constant 0.000000e+00 : f32
    %9 = vector.broadcast %cst_7 : f32 to vector<128x128xf32>
    %c0_8 = arith.constant 0 : index
    %c0_9 = arith.constant 0 : index
    %10 = vector.load %arg5[%c0_8, %c0_9] : memref<128x128xf32, #tpu.memory_space<vmem>>, vector<128x128xf32>
    tpu.vector_store %arg5[%c0_8, %c0_9], %9 {strides = array<i32>} : memref<128x128xf32, #tpu.memory_space<vmem>>, vector<128x128xf32>,
    %c0_10 = arith.constant 0 : index
    %c0_11 = arith.constant 0 : index
    %11 = vector.load %arg5[%c0_10, %c0_11] : memref<128x128xf32, #tpu.memory_space<vmem>>, vector<128x32xf32>
    tpu.vector_store %arg5[%c0_10, %c0_11], %0 {strides = array<i32>} : memref<128x128xf32, #tpu.memory_space<vmem>>, vector<128x32xf32>,
    %c0_12 = arith.constant 0 : index
    %c0_13 = arith.constant 0 : index
    %12 = vector.load %arg5[%c0_12, %c0_13] : memref<128x128xf32, #tpu.memory_space<vmem>>, vector<128x128xf32>
    %13 = arith.addf %8, %12 : vector<128x128xf32>
    %cst_14 = arith.constant dense<0.000000e+00> : vector<128xf32>
    %14 = vector.multi_reduction <add>, %13, %cst_14 [1] : vector<128x128xf32> to vector<128xf32>
    %15 = vector.shape_cast %14 : vector<128xf32> to vector<128x1xf32>
    %cst_15 = arith.constant 0.0333333351 : f32
    %16 = vector.broadcast %cst_15 : f32 to vector<128x1xf32>
    %17 = arith.mulf %15, %16 : vector<128x1xf32>
    %18 = arith.mulf %13, %13 : vector<128x128xf32>
    %cst_16 = arith.constant dense<0.000000e+00> : vector<128xf32>
    %19 = vector.multi_reduction <add>, %18, %cst_16 [1] : vector<128x128xf32> to vector<128xf32>
    %20 = vector.shape_cast %19 : vector<128xf32> to vector<128x1xf32>
    %cst_17 = arith.constant 0.0333333351 : f32
    %21 = vector.broadcast %cst_17 : f32 to vector<128x1xf32>
    %22 = arith.mulf %20, %21 : vector<128x1xf32>
    %23 = arith.mulf %17, %17 : vector<128x1xf32>
    %24 = arith.subf %22, %23 : vector<128x1xf32>
    %cst_18 = arith.constant 0.000000e+00 : f32
    %25 = vector.broadcast %cst_18 : f32 to vector<128x1xf32>
    %26 = arith.maximumf %24, %25 : vector<128x1xf32>
    %27 = vector.broadcast %17 : vector<128x1xf32> to vector<128x128xf32>
    %28 = arith.subf %13, %27 : vector<128x128xf32>
    %cst_19 = arith.constant 9.99999974E-6 : f32
    %29 = vector.broadcast %cst_19 : f32 to vector<128x1xf32>
    %30 = arith.addf %26, %29 : vector<128x1xf32>
    %31 = math.rsqrt %30 : vector<128x1xf32>
    %32 = vector.broadcast %31 : vector<128x1xf32> to vector<128x128xf32>
    %33 = arith.mulf %28, %32 : vector<128x128xf32>
    %c0_20 = arith.constant 0 : index
    %c0_21 = arith.constant 0 : index
    %34 = vector.load %arg4[%c0_20, %c0_21] : memref<128x128xf32, #tpu.memory_space<vmem>>, vector<128x128xf32>
    tpu.vector_store %arg4[%c0_20, %c0_21], %33 {strides = array<i32>} : memref<128x128xf32, #tpu.memory_space<vmem>>, vector<128x128xf32>,
    return
  }
  func.func @transform_0(%arg0: i32) -> (i32, i32) {
    %c0_i32 = arith.constant 0 : i32
    %c0_i32_0 = arith.constant 0 : i32
    return %arg0, %c0_i32 : i32, i32
  }
  func.func @transform_1(%arg0: i32) -> (i32, i32) {
    %c0_i32 = arith.constant 0 : i32
    %c0_i32_0 = arith.constant 0 : i32
    %c0_i32_1 = arith.constant 0 : i32
    return %c0_i32, %c0_i32_0 : i32, i32
  }
  func.func @transform_2(%arg0: i32) -> (i32, i32) {
    %c0_i32 = arith.constant 0 : i32
    %c0_i32_0 = arith.constant 0 : i32
    %c0_i32_1 = arith.constant 0 : i32
    return %c0_i32, %c0_i32_0 : i32, i32
  }
  func.func @transform_3(%arg0: i32) -> (i32, i32) {
    %c0_i32 = arith.constant 0 : i32
    %c0_i32_0 = arith.constant 0 : i32
    return %arg0, %c0_i32 : i32, i32
  }
}

</mosaic_0001>

<bundles_post_ra>
// kernel: poswise_feed_forward_net.1
= control target key start
LH: loop header
LB: loop body
LE: loop exit
PB: predicated region body
PF: predicated region fallthrough
CT: control target
= control target key end

     0   :  { %8 = vsyncpa [#allocation4], 0  ;;  %s2502_s12 = smov [#allocation3]   ;;  %s3073_s0 = inlined_call_operand.vmem [shape: f32[128,32], index: 0, kind: input, shape index: {}]   ;;  %s3074_s1 = inlined_call_operand.vmem [shape: bf16[32,1024], index: 1, kind: input, shape index: {}]   ;;  %s3075_s2 = inlined_call_operand.hbm [shape: bf16[1024,128], index: 2, kind: input, shape index: {}]   ;;  %s3076_s3 = inlined_call_operand.vmem [shape: f32[128,128], index: 3, kind: output, shape index: {}]  }
   0x1   :  { %s18_s13 = sshll.u32 %s2502_s12, 4  ;;  %s19_s13 = int_to_ptr.vmem [resolvable:$true] %s18_s13 }
   0x2   :  { %s2488_s14 = scalar_lea.vmem %s19_s13, 8192  ;;  %p2493_p1 = scmp.lt.s32.totalorder %s19_s13, %s19_s13 }
   0x3   :  { %p2489_p0 = scmp.ne.s32.totalorder %s19_s13, %s2488_s14  ;;  %p2494_p2 = scmp.lt.s32.totalorder %s2488_s14, %s2488_s14 }
   0x5   :  { %p2495_p3 = por %p2494_p2, %p2493_p1 }
   0x7   :  { %p2496_p4 = pnand %p2495_p3, %p2489_p0 }
   0x9   :  { %2499 = shalt.err (!%p2496_p4)
}
   0xa   :  { %s2503_s15 = smov 64   ;;  %s2504_s16 = smov 4  }
   0xb   :  { %24 = dma.hbm_to_vmem [thread:$0]  %s3075_s2, 8192, %s19_s13, [#allocation4], %s2503_s15, %s2503_s15, %s2504_s16  }
   0xc   :  { %2500 = dma.done.wait [#allocation4], 8192  }
   0xd   :  { %2501 = vsyncadd [#allocation4], 4294959104  ;;  %v2505_v0 = vmov 0   ;;  %v2506_v1 = vmov 0.0   ;;  %v61_v2 = vld [vmem:[%s3074_s1 + $0x40] sm:$0xff]  ;;  %v62_v4 = vld [vmem:[%s3074_s1 + $0x48] sm:$0xff] }
   0xe   :  { %206 = vmatprep.mubr.bf16.mxu0 %v2505_v0  ;;  %319 = vmatprep.mubr.bf16.mxu1 %v2505_v0  ;;  %946 = vst [vmem:[#allocation2] sm:$0xff] %v2506_v1  ;;  %947 = vst [vmem:[#allocation2 + $0x8] sm:$0xff] %v2506_v1  ;;  %v65_v3 = vld [vmem:[%s3074_s1 + $0x60] sm:$0xff]  ;;  %v66_v6 = vld [vmem:[%s3074_s1 + $0x68] sm:$0xff]  ;;  %vm149_vm0 = vcmask 261120  }
   0xf   :  { %948 = vst [vmem:[#allocation2 + $0x10] sm:$0xff] %v2506_v1  ;;  %949 = vst [vmem:[#allocation2 + $0x18] sm:$0xff] %v2506_v1  ;;  %v2020_v5 = vcombine.high %v61_v2, %v65_v3  ;;  %v2019_v7 = vcombine.low %v61_v2, %v65_v3  ;;  %v53_v8 = vld [vmem:[%s3074_s1] sm:$0xff]  ;;  %v2022_v10 = vcombine.high %v62_v4, %v66_v6  ;;  %v54_v13 = vld [vmem:[%s3074_s1 + $0x8] sm:$0xff] }
  0x10   :  { %950 = vst [vmem:[#allocation2 + $0x20] sm:$0xff] %v2506_v1  ;;  %951 = vst [vmem:[#allocation2 + $0x28] sm:$0xff] %v2506_v1  ;;  %v57_v9 = vld [vmem:[%s3074_s1 + $0x20] sm:$0xff]  ;;  %v2021_v11 = vcombine.low %v62_v4, %v66_v6  ;;  %v58_v14 = vld [vmem:[%s3074_s1 + $0x28] sm:$0xff] }
  0x11   :  { %952 = vst [vmem:[#allocation2 + $0x30] sm:$0xff] %v2506_v1  ;;  %953 = vst [vmem:[#allocation2 + $0x38] sm:$0xff] %v2506_v1  ;;  %v2012_v12 = vcombine.high %v53_v8, %v57_v9  ;;  %v29_v15 = vld [vmem:[%s3073_s0] sm:$0xff]  ;;  %186 = vmatprep.subr.bf16.mxu0 %v2020_v5  ;;  %v2014_v16 = vcombine.high %v54_v13, %v58_v14  ;;  %v30_v17 = vld [vmem:[%s3073_s0 + $0x8] sm:$0xff]  ;;  %299 = vmatprep.subr.bf16.mxu1 %v2022_v10 }
  0x12   :  { %954 = vst [vmem:[#allocation2 + $0x40] sm:$0xff] %v2506_v1  ;;  %955 = vst [vmem:[#allocation2 + $0x48] sm:$0xff] %v2506_v1  ;;  %v63_v18 = vld [vmem:[%s3074_s1 + $0x50] sm:$0xff]  ;;  %187 = vmatpush1.bf16.msra.mxu0 %v2019_v7  ;;  %v2011_v20 = vcombine.low %v53_v8, %v57_v9  ;;  %v64_v21 = vld [vmem:[%s3074_s1 + $0x58] sm:$0xff]  ;;  %300 = vmatpush1.bf16.msra.mxu1 %v2021_v11  ;;  %v2013_v24 = vcombine.low %v54_v13, %v58_v14 }
  0x13   :  { %956 = vst [vmem:[#allocation2 + $0x50] sm:$0xff] %v2506_v1  ;;  %957 = vst [vmem:[#allocation2 + $0x58] sm:$0xff] %v2506_v1  ;;  %v67_v19 = vld [vmem:[%s3074_s1 + $0x70] sm:$0xff]  ;;  %v68_v22 = vld [vmem:[%s3074_s1 + $0x78] sm:$0xff]  ;;  %188 = vmatprep.subr.bf16.mxu0 %v2012_v12  ;;  %301 = vmatprep.subr.bf16.mxu1 %v2014_v16  ;;  %v2601_v33 = vpack.c.bf16 %v30_v17, %v29_v15 }
  0x14   :  { %958 = vst [vmem:[#allocation2 + $0x60] sm:$0xff] %v2506_v1  ;;  %959 = vst [vmem:[#allocation2 + $0x68] sm:$0xff] %v2506_v1  ;;  %v31_v23 = vld [vmem:[%s3073_s0 + $0x10] sm:$0xff]  ;;  %v2024_v25 = vcombine.high %v63_v18, %v67_v19  ;;  %v32_v26 = vld [vmem:[%s3073_s0 + $0x18] sm:$0xff]  ;;  %v2026_v29 = vcombine.high %v64_v21, %v68_v22  ;;  %v2023_v37 = vcombine.low %v63_v18, %v67_v19 }
  0x15   :  { %960 = vst [vmem:[#allocation2 + $0x70] sm:$0xff] %v2506_v1  ;;  %961 = vst [vmem:[#allocation2 + $0x78] sm:$0xff] %v2506_v1  ;;  %v33_v27 = vld [vmem:[%s3073_s0 + $0x20] sm:$0xff]  ;;  %v34_v28 = vld [vmem:[%s3073_s0 + $0x28] sm:$0xff]  ;;  %v2025_v41 = vcombine.low %v64_v21, %v68_v22  ;;  %v2652_v53 = vpack.c.bf16 %v32_v26, %v31_v23 }
  0x16   :  { %962 = vst.msk [vmem:[#allocation2] sm:$0xff] %vm149_vm0, %v29_v15  ;;  %963 = vst.msk [vmem:[#allocation2 + $0x8] sm:$0xff] %vm149_vm0, %v30_v17  ;;  %v35_v30 = vld [vmem:[%s3073_s0 + $0x30] sm:$0xff]  ;;  %v36_v31 = vld [vmem:[%s3073_s0 + $0x38] sm:$0xff]  ;;  %189 = vmatpush1.bf16.msra.mxu0 %v2011_v20  ;;  %302 = vmatpush1.bf16.msra.mxu1 %v2013_v24  ;;  %v2660_v54 = vpack.c.bf16 %v34_v28, %v33_v27 }
  0x17   :  { %964 = vst.msk [vmem:[#allocation2 + $0x10] sm:$0xff] %vm149_vm0, %v31_v23  ;;  %965 = vst.msk [vmem:[#allocation2 + $0x18] sm:$0xff] %vm149_vm0, %v32_v26  ;;  %v37_v32 = vld [vmem:[%s3073_s0 + $0x40] sm:$0xff]  ;;  %v38_v34 = vld [vmem:[%s3073_s0 + $0x48] sm:$0xff]  ;;  %412 = vmatprep.subr.bf16.mxu0 %v2024_v25  ;;  %525 = vmatprep.subr.bf16.mxu1 %v2026_v29  ;;  %v2668_v55 = vpack.c.bf16 %v36_v31, %v35_v30 }
  0x18   :  { %966 = vst.msk [vmem:[#allocation2 + $0x20] sm:$0xff] %vm149_vm0, %v33_v27  ;;  %967 = vst.msk [vmem:[#allocation2 + $0x28] sm:$0xff] %vm149_vm0, %v34_v28  ;;  %v55_v35 = vld [vmem:[%s3074_s1 + $0x10] sm:$0xff]  ;;  %v56_v38 = vld [vmem:[%s3074_s1 + $0x18] sm:$0xff]  ;;  %v2676_v56 = vpack.c.bf16 %v38_v34, %v37_v32 }
  0x19   :  { %968 = vst.msk [vmem:[#allocation2 + $0x30] sm:$0xff] %vm149_vm0, %v35_v30  ;;  %969 = vst.msk [vmem:[#allocation2 + $0x38] sm:$0xff] %vm149_vm0, %v36_v31  ;;  %v59_v36 = vld [vmem:[%s3074_s1 + $0x30] sm:$0xff]  ;;  %v60_v39 = vld [vmem:[%s3074_s1 + $0x38] sm:$0xff]  ;;  %2027 = vmatmul.mubr.msk.bf16.vlgmr.msra.gmra.mxu0 %vm149_vm0, %v2601_v33  ;;  %2035 = vmatmul.mubr.msk.bf16.vlgmr.msra.gmra.mxu1 %vm149_vm0, %v2601_v33 }
  0x1a   :  { %970 = vst.msk [vmem:[#allocation2 + $0x40] sm:$0xff] %vm149_vm0, %v37_v32  ;;  %971 = vst.msk [vmem:[#allocation2 + $0x48] sm:$0xff] %vm149_vm0, %v38_v34  ;;  %v39_v40 = vld [vmem:[%s3073_s0 + $0x50] sm:$0xff]  ;;  %v40_v42 = vld [vmem:[%s3073_s0 + $0x58] sm:$0xff]  ;;  %v2016_v45 = vcombine.high %v55_v35, %v59_v36  ;;  %v2018_v48 = vcombine.high %v56_v38, %v60_v39  ;;  %413 = vmatpush1.bf16.msra.mxu0 %v2023_v37  ;;  %v2015_v49 = vcombine.low %v55_v35, %v59_v36 }
  0x1b   :  { %972 = vst.msk [vmem:[#allocation2 + $0x50] sm:$0xff] %vm149_vm0, %v39_v40  ;;  %v41_v43 = vld [vmem:[%s3073_s0 + $0x60] sm:$0xff]  ;;  %v42_v44 = vld [vmem:[%s3073_s0 + $0x68] sm:$0xff]  ;;  %973 = vst.msk [vmem:[#allocation2 + $0x58] sm:$0xff] %vm149_vm0, %v40_v42  ;;  %526 = vmatpush1.bf16.msra.mxu1 %v2025_v41  ;;  %216 = vmatprep.mubr.bf16.mxu0 %v2505_v0  ;;  %v2017_v50 = vcombine.low %v56_v38, %v60_v39  ;;  %v2684_v57 = vpack.c.bf16 %v40_v42, %v39_v40 }
  0x1c   :  { %974 = vst.msk [vmem:[#allocation2 + $0x60] sm:$0xff] %vm149_vm0, %v41_v43  ;;  %975 = vst.msk [vmem:[#allocation2 + $0x68] sm:$0xff] %vm149_vm0, %v42_v44  ;;  %v43_v46 = vld [vmem:[%s3073_s0 + $0x70] sm:$0xff]  ;;  %v44_v47 = vld [vmem:[%s3073_s0 + $0x78] sm:$0xff]  ;;  %329 = vmatprep.mubr.bf16.mxu1 %v2505_v0  ;;  %414 = vmatprep.subr.bf16.mxu0 %v2016_v45  ;;  %v2692_v58 = vpack.c.bf16 %v42_v44, %v41_v43 }
  0x1d   :  { %976 = vst.msk [vmem:[#allocation2 + $0x70] sm:$0xff] %vm149_vm0, %v43_v46  ;;  %977 = vst.msk [vmem:[#allocation2 + $0x78] sm:$0xff] %vm149_vm0, %v44_v47  ;;  %v2384_v51 = vld [vmem:[#allocation3 + $0x78] sm:$0xff]   ;;  %527 = vmatprep.subr.bf16.mxu1 %v2018_v48  ;;  %v2700_v59 = vpack.c.bf16 %v44_v47, %v43_v46  ;;  %v2388_v62 = vld [vmem:[#allocation3 + $0x70] sm:$0xff]  }
  0x1e   :  { %v2386_v52 = vld [vmem:[#allocation3 + $0xf8] sm:$0xff]   ;;  %415 = vmatpush1.bf16.msra.mxu0 %v2015_v49  ;;  %v2390_v63 = vld [vmem:[#allocation3 + $0xf0] sm:$0xff]   ;;  %v2392_v3 = vld [vmem:[#allocation3 + $0x68] sm:$0xff]  }
  0x1f   :  { %528 = vmatpush1.bf16.msra.mxu1 %v2017_v50  ;;  %2123 = vmatprep.subr.bf16.mxu0 %v2384_v51  ;;  %v2385_v60 = vld [vmem:[#allocation3 + $0x38] sm:$0xff]   ;;  %v2389_v1 = vld [vmem:[#allocation3 + $0x30] sm:$0xff]   ;;  %v2394_v4 = vld [vmem:[#allocation3 + $0xe8] sm:$0xff]  }
  0x20   :  { %2187 = vmatprep.subr.bf16.mxu1 %v2386_v52  ;;  %v2387_v61 = vld [vmem:[#allocation3 + $0xb8] sm:$0xff]   ;;  %v2391_v2 = vld [vmem:[#allocation3 + $0xb0] sm:$0xff]   ;;  %v2393_v5 = vld [vmem:[#allocation3 + $0x28] sm:$0xff]  }
  0x21   :  { %2028 = vmatmul.mubr.msk.bf16.gmra.mxu0 %vm149_vm0, %v2652_v53  ;;  %2036 = vmatmul.mubr.msk.bf16.gmra.mxu1 %vm149_vm0, %v2652_v53  ;;  %v2395_v6 = vld [vmem:[#allocation3 + $0xa8] sm:$0xff]   ;;  %v2396_v7 = vld [vmem:[#allocation3 + $0x60] sm:$0xff]   ;;  %v2400_v11 = vld [vmem:[#allocation3 + $0x58] sm:$0xff]  }
  0x22   :  { %226 = vmatprep.mubr.bf16.mxu0 %v2505_v0  ;;  %339 = vmatprep.mubr.bf16.mxu1 %v2505_v0  ;;  %v2398_v8 = vld [vmem:[#allocation3 + $0xe0] sm:$0xff]   ;;  %v2402_v12 = vld [vmem:[#allocation3 + $0xd8] sm:$0xff]   ;;  %v2404_v15 = vld [vmem:[#allocation3 + $0x50] sm:$0xff]  }
  0x23   :  { %v2397_v9 = vld [vmem:[#allocation3 + $0x20] sm:$0xff]   ;;  %v2401_v13 = vld [vmem:[#allocation3 + $0x18] sm:$0xff]   ;;  %v2406_v16 = vld [vmem:[#allocation3 + $0xd0] sm:$0xff]  }
  0x24   :  { %v2399_v10 = vld [vmem:[#allocation3 + $0xa0] sm:$0xff]   ;;  %v2403_v14 = vld [vmem:[#allocation3 + $0x98] sm:$0xff]   ;;  %v2405_v17 = vld [vmem:[#allocation3 + $0x10] sm:$0xff]  }
  0x25   :  { %v2407_v18 = vld [vmem:[#allocation3 + $0x90] sm:$0xff]   ;;  %v2408_v19 = vld [vmem:[#allocation3 + $0x48] sm:$0xff]   ;;  %v2412_v23 = vld [vmem:[#allocation3 + $0x40] sm:$0xff]  }
  0x26   :  { %v2410_v20 = vld [vmem:[#allocation3 + $0xc8] sm:$0xff]   ;;  %v2414_v24 = vld [vmem:[#allocation3 + $0xc0] sm:$0xff]   ;;  %v2416_v27 = vld [vmem:[#allocation3 + $0x178] sm:$0xff]  }
  0x27   :  { %v2409_v21 = vld [vmem:[#allocation3 + $0x8] sm:$0xff]   ;;  %v2413_v25 = vld [vmem:[#allocation3] sm:$0xff]   ;;  %v2418_v28 = vld [vmem:[#allocation3 + $0x1f8] sm:$0xff]  }
  0x28   :  { %v2411_v22 = vld [vmem:[#allocation3 + $0x88] sm:$0xff]   ;;  %v2415_v26 = vld [vmem:[#allocation3 + $0x80] sm:$0xff]   ;;  %v2417_v47 = vld [vmem:[#allocation3 + $0x138] sm:$0xff]  }
  0x29   :  { %2029 = vmatmul.mubr.msk.bf16.gmra.mxu0 %vm149_vm0, %v2660_v54  ;;  %2037 = vmatmul.mubr.msk.bf16.gmra.mxu1 %vm149_vm0, %v2660_v54  ;;  %v2419_v51 = vld [vmem:[#allocation3 + $0x1b8] sm:$0xff]   ;;  %v2420_v52 = vld [vmem:[#allocation3 + $0x170] sm:$0xff]  }
  0x2a   :  { %236 = vmatprep.mubr.bf16.mxu0 %v2505_v0  ;;  %349 = vmatprep.mubr.bf16.mxu1 %v2505_v0 }
  0x31   :  { %2030 = vmatmul.mubr.msk.bf16.gmra.mxu0 %vm149_vm0, %v2668_v55  ;;  %2038 = vmatmul.mubr.msk.bf16.gmra.mxu1 %vm149_vm0, %v2668_v55 }
  0x32   :  { %246 = vmatprep.mubr.bf16.mxu0 %v2505_v0  ;;  %359 = vmatprep.mubr.bf16.mxu1 %v2505_v0 }
  0x39   :  { %2031 = vmatmul.mubr.msk.bf16.gmra.mxu0 %vm149_vm0, %v2676_v56  ;;  %2039 = vmatmul.mubr.msk.bf16.gmra.mxu1 %vm149_vm0, %v2676_v56 }
  0x3a   :  { %256 = vmatprep.mubr.bf16.mxu0 %v2505_v0  ;;  %369 = vmatprep.mubr.bf16.mxu1 %v2505_v0 }
  0x41   :  { %2032 = vmatmul.mubr.msk.bf16.gmra.mxu0 %vm149_vm0, %v2684_v57  ;;  %2040 = vmatmul.mubr.msk.bf16.gmra.mxu1 %vm149_vm0, %v2684_v57 }
  0x42   :  { %266 = vmatprep.mubr.bf16.mxu0 %v2505_v0  ;;  %379 = vmatprep.mubr.bf16.mxu1 %v2505_v0 }
  0x49   :  { %2033 = vmatmul.mubr.msk.bf16.gmra.mxu0 %vm149_vm0, %v2692_v58  ;;  %2041 = vmatmul.mubr.msk.bf16.gmra.mxu1 %vm149_vm0, %v2692_v58 }
  0x4a   :  { %276 = vmatprep.mubr.bf16.mxu0 %v2505_v0  ;;  %389 = vmatprep.mubr.bf16.mxu1 %v2505_v0 }
  0x51   :  { %2034 = vmatmul.mubr.msk.bf16.gmra.mxu0 %vm149_vm0, %v2700_v59  ;;  %2042 = vmatmul.mubr.msk.bf16.gmra.mxu1 %vm149_vm0, %v2700_v59 }
  0x52   :  { %432 = vmatprep.mubr.bf16.mxu0 %v2505_v0  ;;  %545 = vmatprep.mubr.bf16.mxu1 %v2505_v0 }
  0x59   :  { %2043 = vmatmul.mubr.msk.bf16.vlgmr.msra.gmra.mxu0 %vm149_vm0, %v2601_v33  ;;  %2051 = vmatmul.mubr.msk.bf16.vlgmr.msra.gmra.mxu1 %vm149_vm0, %v2601_v33 }
  0x5a   :  { %442 = vmatprep.mubr.bf16.mxu0 %v2505_v0  ;;  %555 = vmatprep.mubr.bf16.mxu1 %v2505_v0 }
  0x5b   :  { %2124 = vmatpush3.bf16.msra.mxu0 %v2385_v60  ;;  %2188 = vmatpush3.bf16.msra.mxu1 %v2387_v61  ;;  %v2423_v61 = vld [vmem:[#allocation3 + $0x1b0] sm:$0xff]  }
  0x5c   :  { %2125 = vmatprep.subr.bf16.mxu0 %v2388_v62  ;;  %2189 = vmatprep.subr.bf16.mxu1 %v2390_v63  ;;  %v2424_v62 = vld [vmem:[#allocation3 + $0x168] sm:$0xff]  }
  0x5f   :  { %2126 = vmatpush3.bf16.msra.mxu0 %v2389_v1  ;;  %2190 = vmatpush3.bf16.msra.mxu1 %v2391_v2 }
  0x60   :  { %2127 = vmatprep.subr.bf16.mxu0 %v2392_v3  ;;  %2191 = vmatprep.subr.bf16.mxu1 %v2394_v4  ;;  %v2426_v4 = vld [vmem:[#allocation3 + $0x1e8] sm:$0xff]  }
  0x61   :  { %2044 = vmatmul.mubr.msk.bf16.gmra.mxu0 %vm149_vm0, %v2652_v53  ;;  %2052 = vmatmul.mubr.msk.bf16.gmra.mxu1 %vm149_vm0, %v2652_v53 }
  0x62   :  { %452 = vmatprep.mubr.bf16.mxu0 %v2505_v0  ;;  %565 = vmatprep.mubr.bf16.mxu1 %v2505_v0 }
  0x63   :  { %2128 = vmatpush3.bf16.msra.mxu0 %v2393_v5  ;;  %2192 = vmatpush3.bf16.msra.mxu1 %v2395_v6 }
  0x64   :  { %2129 = vmatprep.subr.bf16.mxu0 %v2396_v7  ;;  %2193 = vmatprep.subr.bf16.mxu1 %v2398_v8 }
  0x67   :  { %2130 = vmatpush3.bf16.msra.mxu0 %v2397_v9  ;;  %2194 = vmatpush3.bf16.msra.mxu1 %v2399_v10 }
  0x68   :  { %2131 = vmatprep.subr.bf16.mxu0 %v2400_v11  ;;  %2195 = vmatprep.subr.bf16.mxu1 %v2402_v12  ;;  %v2425_v12 = vld [vmem:[#allocation3 + $0x128] sm:$0xff]  }
  0x69   :  { %2045 = vmatmul.mubr.msk.bf16.gmra.mxu0 %vm149_vm0, %v2660_v54  ;;  %2053 = vmatmul.mubr.msk.bf16.gmra.mxu1 %vm149_vm0, %v2660_v54 }
  0x6a   :  { %462 = vmatprep.mubr.bf16.mxu0 %v2505_v0  ;;  %575 = vmatprep.mubr.bf16.mxu1 %v2505_v0 }
  0x6b   :  { %2132 = vmatpush3.bf16.msra.mxu0 %v2401_v13  ;;  %2196 = vmatpush3.bf16.msra.mxu1 %v2403_v14 }
  0x6c   :  { %2133 = vmatprep.subr.bf16.mxu0 %v2404_v15  ;;  %2197 = vmatprep.subr.bf16.mxu1 %v2406_v16  ;;  %v2427_v16 = vld [vmem:[#allocation3 + $0x1a8] sm:$0xff]  }
  0x6f   :  { %2134 = vmatpush3.bf16.msra.mxu0 %v2405_v17  ;;  %2198 = vmatpush3.bf16.msra.mxu1 %v2407_v18  ;;  %v2428_v17 = vld [vmem:[#allocation3 + $0x160] sm:$0xff]  }
  0x70   :  { %2135 = vmatprep.subr.bf16.mxu0 %v2408_v19  ;;  %2199 = vmatprep.subr.bf16.mxu1 %v2410_v20  ;;  %v2430_v20 = vld [vmem:[#allocation3 + $0x1e0] sm:$0xff]  }
  0x71   :  { %2046 = vmatmul.mubr.msk.bf16.gmra.mxu0 %vm149_vm0, %v2668_v55  ;;  %2054 = vmatmul.mubr.msk.bf16.gmra.mxu1 %vm149_vm0, %v2668_v55  ;;  %v2422_v55 = vld [vmem:[#allocation3 + $0x1f0] sm:$0xff]  }
  0x72   :  { %472 = vmatprep.mubr.bf16.mxu0 %v2505_v0  ;;  %585 = vmatprep.mubr.bf16.mxu1 %v2505_v0 }
  0x73   :  { %2136 = vmatpush3.bf16.msra.mxu0 %v2409_v21  ;;  %2200 = vmatpush3.bf16.msra.mxu1 %v2411_v22 }
  0x74   :  { %2137 = vmatprep.subr.bf16.mxu0 %v2412_v23  ;;  %2201 = vmatprep.subr.bf16.mxu1 %v2414_v24  ;;  %v2429_v23 = vld [vmem:[#allocation3 + $0x120] sm:$0xff]  }
  0x77   :  { %2138 = vmatpush3.bf16.msra.mxu0 %v2413_v25  ;;  %2202 = vmatpush3.bf16.msra.mxu1 %v2415_v26  ;;  %v2431_v26 = vld [vmem:[#allocation3 + $0x1a0] sm:$0xff]  }
  0x78   :  { %2251 = vmatprep.subr.bf16.mxu0 %v2416_v27  ;;  %2315 = vmatprep.subr.bf16.mxu1 %v2418_v28  ;;  %v2432_v27 = vld [vmem:[#allocation3 + $0x158] sm:$0xff]  }
  0x79   :  { %2047 = vmatmul.mubr.msk.bf16.gmra.mxu0 %vm149_vm0, %v2676_v56  ;;  %2055 = vmatmul.mubr.msk.bf16.gmra.mxu1 %vm149_vm0, %v2676_v56 }
  0x7a   :  { %482 = vmatprep.mubr.bf16.mxu0 %v2505_v0  ;;  %595 = vmatprep.mubr.bf16.mxu1 %v2505_v0 }
  0x81   :  { %2048 = vmatmul.mubr.msk.bf16.gmra.mxu0 %vm149_vm0, %v2684_v57  ;;  %2056 = vmatmul.mubr.msk.bf16.gmra.mxu1 %vm149_vm0, %v2684_v57 }
  0x82   :  { %492 = vmatprep.mubr.bf16.mxu0 %v2505_v0  ;;  %605 = vmatprep.mubr.bf16.mxu1 %v2505_v0 }
  0x89   :  { %2049 = vmatmul.mubr.msk.bf16.gmra.mxu0 %vm149_vm0, %v2692_v58  ;;  %2057 = vmatmul.mubr.msk.bf16.gmra.mxu1 %vm149_vm0, %v2692_v58  ;;  %v2421_v58 = vld [vmem:[#allocation3 + $0x130] sm:$0xff]  }
  0x8a   :  { %502 = vmatprep.mubr.bf16.mxu0 %v2505_v0  ;;  %615 = vmatprep.mubr.bf16.mxu1 %v2505_v0 }
  0x91   :  { %2050 = vmatmul.mubr.msk.bf16.gmra.mxu0 %vm149_vm0, %v2700_v59  ;;  %2058 = vmatmul.mubr.msk.bf16.gmra.mxu1 %vm149_vm0, %v2700_v59 }
  0xd9   :  { %v208_v29 = vpop.f32.mrf.mxu0  ;;  %v321_v30 = vpop.f32.mrf.mxu1 }
  0xda   :  { %v626_v41 = vmax.f32 %v208_v29, 0.0  ;;  %v628_v44 = vmax.f32 %v321_v30, 0.0 }
  0xdb   :  { %v210_v31 = vpop.f32.mrf.mxu0  ;;  %v323_v32 = vpop.f32.mrf.mxu1 }
  0xdc   :  { %v627_v37 = vmax.f32 %v210_v31, 0.0  ;;  %v629_v0 = vmax.f32 %v323_v32, 0.0  ;;  %v2434_v32 = vld [vmem:[#allocation3 + $0x1d8] sm:$0xff]  }
  0xdd   :  { %v212_v33 = vpop.f32.mrf.mxu0  ;;  %v325_v34 = vpop.f32.mrf.mxu1 }
  0xde   :  { %v634_v35 = vmax.f32 %v212_v33, 0.0  ;;  %v636_v38 = vmax.f32 %v325_v34, 0.0 }
  0xdf   :  { %v214_v36 = vpop.f32.mrf.mxu0  ;;  %v327_v40 = vpop.f32.mrf.mxu1 }
  0xe0   :  { %v635_v39 = vmax.f32 %v214_v36, 0.0  ;;  %v637_v42 = vmax.f32 %v327_v40, 0.0  ;;  %v754_v48 = vpack.c.bf16 %v634_v35, %v626_v41  ;;  %v756_v53 = vpack.c.bf16 %v636_v38, %v628_v44  ;;  %v2433_v40 = vld [vmem:[#allocation3 + $0x118] sm:$0xff]   ;;  %v2436_v44 = vld [vmem:[#allocation3 + $0x150] sm:$0xff]  }
  0xe1   :  { %v218_v43 = vpop.f32.mrf.mxu0  ;;  %v331_v46 = vpop.f32.mrf.mxu1 }
  0xe2   :  { %v755_v45 = vpack.c.bf16 %v635_v39, %v627_v37  ;;  %v757_v49 = vpack.c.bf16 %v637_v42, %v629_v0  ;;  %v642_v5 = vmax.f32 %v218_v43, 0.0  ;;  %v644_v9 = vmax.f32 %v331_v46, 0.0  ;;  %v2435_v43 = vld [vmem:[#allocation3 + $0x198] sm:$0xff]  }
  0xe3   :  { %v220_v50 = vpop.f32.mrf.mxu0  ;;  %v333_v54 = vpop.f32.mrf.mxu1 }
  0xe4   :  { %1410 = vmatprep.mubr.bf16.mxu0 %v755_v45  ;;  %1507 = vmatprep.mubr.bf16.mxu1 %v757_v49  ;;  %v643_v63 = vmax.f32 %v220_v50, 0.0  ;;  %v645_v6 = vmax.f32 %v333_v54, 0.0  ;;  %v2437_v50 = vld [vmem:[#allocation3 + $0x110] sm:$0xff]   ;;  %v2440_v54 = vld [vmem:[#allocation3 + $0x148] sm:$0xff]  }
  0xe5   :  { %v222_v56 = vpop.f32.mrf.mxu0  ;;  %1411 = vmatmul.mubr.bf16.vlgmr.msra.gmra.mxu0 %v754_v48  ;;  %v335_v57 = vpop.f32.mrf.mxu1  ;;  %1508 = vmatmul.mubr.bf16.vlgmr.msra.gmra.mxu1 %v756_v53  ;;  %v2439_v53 = vld [vmem:[#allocation3 + $0x190] sm:$0xff]  }
  0xe6   :  { %2252 = vmatpush3.bf16.msra.mxu0 %v2417_v47  ;;  %v650_v59 = vmax.f32 %v222_v56, 0.0  ;;  %2316 = vmatpush3.bf16.msra.mxu1 %v2419_v51  ;;  %v652_v1 = vmax.f32 %v335_v57, 0.0  ;;  %v2438_v47 = vld [vmem:[#allocation3 + $0x1d0] sm:$0xff]  }
  0xe7   :  { %v224_v60 = vpop.f32.mrf.mxu0  ;;  %2253 = vmatprep.subr.bf16.mxu0 %v2420_v52  ;;  %v337_v3 = vpop.f32.mrf.mxu1  ;;  %2317 = vmatprep.subr.bf16.mxu1 %v2422_v55 }
  0xe8   :  { %v651_v2 = vmax.f32 %v224_v60, 0.0  ;;  %v653_v7 = vmax.f32 %v337_v3, 0.0  ;;  %v762_v13 = vpack.c.bf16 %v650_v59, %v642_v5  ;;  %v764_v18 = vpack.c.bf16 %v652_v1, %v644_v9  ;;  %v2442_v59 = vld [vmem:[#allocation3 + $0x1c8] sm:$0xff]   ;;  %v2444_v9 = vld [vmem:[#allocation3 + $0x140] sm:$0xff]  }
  0xe9   :  { %v228_v8 = vpop.f32.mrf.mxu0  ;;  %v341_v11 = vpop.f32.mrf.mxu1 }
  0xea   :  { %v763_v10 = vpack.c.bf16 %v651_v2, %v643_v63  ;;  %2254 = vmatpush3.bf16.msra.mxu0 %v2421_v58  ;;  %v765_v14 = vpack.c.bf16 %v653_v7, %v645_v6  ;;  %2318 = vmatpush3.bf16.msra.mxu1 %v2423_v61  ;;  %v658_v33 = vmax.f32 %v228_v8, 0.0  ;;  %v660_v37 = vmax.f32 %v341_v11, 0.0  ;;  %v2443_v8 = vld [vmem:[#allocation3 + $0x188] sm:$0xff]  }
  0xeb   :  { %v230_v15 = vpop.f32.mrf.mxu0  ;;  %2255 = vmatprep.subr.bf16.mxu0 %v2424_v62  ;;  %v343_v19 = vpop.f32.mrf.mxu1  ;;  %2319 = vmatprep.subr.bf16.mxu1 %v2426_v4  ;;  %v2441_v4 = vld [vmem:[#allocation3 + $0x108] sm:$0xff]  }
  0xec   :  { %1418 = vmatprep.mubr.bf16.mxu0 %v763_v10  ;;  %1515 = vmatprep.mubr.bf16.mxu1 %v765_v14  ;;  %v659_v28 = vmax.f32 %v230_v15, 0.0  ;;  %v661_v34 = vmax.f32 %v343_v19, 0.0  ;;  %v2445_v15 = vld [vmem:[#allocation3 + $0x100] sm:$0xff]  }
  0xed   :  { %v232_v21 = vpop.f32.mrf.mxu0  ;;  %1419 = vmatmul.mubr.bf16.gmra.mxu0 %v762_v13  ;;  %v345_v22 = vpop.f32.mrf.mxu1  ;;  %1516 = vmatmul.mubr.bf16.gmra.mxu1 %v764_v18  ;;  %v2447_v18 = vld [vmem:[#allocation3 + $0x180] sm:$0xff]  }
  0xee   :  { %2256 = vmatpush3.bf16.msra.mxu0 %v2425_v12  ;;  %v666_v24 = vmax.f32 %v232_v21, 0.0  ;;  %2320 = vmatpush3.bf16.msra.mxu1 %v2427_v16  ;;  %v668_v29 = vmax.f32 %v345_v22, 0.0  ;;  %v2446_v12 = vld [vmem:[#allocation3 + $0x1c0] sm:$0xff]  }
  0xef   :  { %v234_v25 = vpop.f32.mrf.mxu0  ;;  %2257 = vmatprep.subr.bf16.mxu0 %v2428_v17  ;;  %v347_v31 = vpop.f32.mrf.mxu1  ;;  %2321 = vmatprep.subr.bf16.mxu1 %v2430_v20 }
  0xf0   :  { %v667_v30 = vmax.f32 %v234_v25, 0.0  ;;  %v669_v35 = vmax.f32 %v347_v31, 0.0  ;;  %v770_v41 = vpack.c.bf16 %v666_v24, %v658_v33  ;;  %v772_v45 = vpack.c.bf16 %v668_v29, %v660_v37 }
  0xf1   :  { %v238_v36 = vpop.f32.mrf.mxu0  ;;  %v351_v39 = vpop.f32.mrf.mxu1 }
  0xf2   :  { %v771_v38 = vpack.c.bf16 %v667_v30, %v659_v28  ;;  %2258 = vmatpush3.bf16.msra.mxu0 %v2429_v23  ;;  %v773_v0 = vpack.c.bf16 %v669_v35, %v661_v34  ;;  %2322 = vmatpush3.bf16.msra.mxu1 %v2431_v26  ;;  %v674_v60 = vmax.f32 %v238_v36, 0.0  ;;  %v676_v1 = vmax.f32 %v351_v39, 0.0 }
  0xf3   :  { %v240_v42 = vpop.f32.mrf.mxu0  ;;  %2259 = vmatprep.subr.bf16.mxu0 %v2432_v27  ;;  %v353_v46 = vpop.f32.mrf.mxu1  ;;  %2323 = vmatprep.subr.bf16.mxu1 %v2434_v32 }
  0xf4   :  { %1426 = vmatprep.mubr.bf16.mxu0 %v771_v38  ;;  %1523 = vmatprep.mubr.bf16.mxu1 %v773_v0  ;;  %v675_v55 = vmax.f32 %v240_v42, 0.0  ;;  %v677_v61 = vmax.f32 %v353_v46, 0.0 }
  0xf5   :  { %v242_v48 = vpop.f32.mrf.mxu0  ;;  %1427 = vmatmul.mubr.bf16.gmra.mxu0 %v770_v41  ;;  %v355_v49 = vpop.f32.mrf.mxu1  ;;  %1524 = vmatmul.mubr.bf16.gmra.mxu1 %v772_v45 }
  0xf6   :  { %2260 = vmatpush3.bf16.msra.mxu0 %v2433_v40  ;;  %v682_v51 = vmax.f32 %v242_v48, 0.0  ;;  %2324 = vmatpush3.bf16.msra.mxu1 %v2435_v43  ;;  %v684_v56 = vmax.f32 %v355_v49, 0.0 }
  0xf7   :  { %v244_v52 = vpop.f32.mrf.mxu0  ;;  %2261 = vmatprep.subr.bf16.mxu0 %v2436_v44  ;;  %v357_v58 = vpop.f32.mrf.mxu1  ;;  %2325 = vmatprep.subr.bf16.mxu1 %v2438_v47 }
  0xf8   :  { %v683_v57 = vmax.f32 %v244_v52, 0.0  ;;  %v685_v62 = vmax.f32 %v357_v58, 0.0  ;;  %v778_v5 = vpack.c.bf16 %v682_v51, %v674_v60  ;;  %v780_v10 = vpack.c.bf16 %v684_v56, %v676_v1 }
  0xf9   :  { %v248_v63 = vpop.f32.mrf.mxu0  ;;  %v361_v3 = vpop.f32.mrf.mxu1 }
  0xfa   :  { %v779_v2 = vpack.c.bf16 %v683_v57, %v675_v55  ;;  %2262 = vmatpush3.bf16.msra.mxu0 %v2437_v50  ;;  %v781_v6 = vpack.c.bf16 %v685_v62, %v677_v61  ;;  %2326 = vmatpush3.bf16.msra.mxu1 %v2439_v53  ;;  %v690_v23 = vmax.f32 %v248_v63, 0.0  ;;  %v692_v27 = vmax.f32 %v361_v3, 0.0 }
  0xfb   :  { %v250_v7 = vpop.f32.mrf.mxu0  ;;  %2263 = vmatprep.subr.bf16.mxu0 %v2440_v54  ;;  %v363_v11 = vpop.f32.mrf.mxu1  ;;  %2327 = vmatprep.subr.bf16.mxu1 %v2442_v59 }
  0xfc   :  { %1434 = vmatprep.mubr.bf16.mxu0 %v779_v2  ;;  %1531 = vmatprep.mubr.bf16.mxu1 %v781_v6  ;;  %v691_v19 = vmax.f32 %v250_v7, 0.0  ;;  %v693_v24 = vmax.f32 %v363_v11, 0.0 }
  0xfd   :  { %v252_v13 = vpop.f32.mrf.mxu0  ;;  %1435 = vmatmul.mubr.bf16.gmra.mxu0 %v778_v5  ;;  %v365_v14 = vpop.f32.mrf.mxu1  ;;  %1532 = vmatmul.mubr.bf16.gmra.mxu1 %v780_v10 }
  0xfe   :  { %2264 = vmatpush3.bf16.msra.mxu0 %v2441_v4  ;;  %v698_v16 = vmax.f32 %v252_v13, 0.0  ;;  %2328 = vmatpush3.bf16.msra.mxu1 %v2443_v8  ;;  %v700_v20 = vmax.f32 %v365_v14, 0.0 }
  0xff   :  { %v254_v17 = vpop.f32.mrf.mxu0  ;;  %2265 = vmatprep.subr.bf16.mxu0 %v2444_v9  ;;  %v367_v22 = vpop.f32.mrf.mxu1  ;;  %2329 = vmatprep.subr.bf16.mxu1 %v2446_v12 }
 0x100   :  { %v699_v21 = vmax.f32 %v254_v17, 0.0  ;;  %v701_v25 = vmax.f32 %v367_v22, 0.0  ;;  %v786_v30 = vpack.c.bf16 %v698_v16, %v690_v23  ;;  %v788_v33 = vpack.c.bf16 %v700_v20, %v692_v27 }
 0x101   :  { %v258_v26 = vpop.f32.mrf.mxu0  ;;  %v371_v29 = vpop.f32.mrf.mxu1 }
 0x102   :  { %v787_v28 = vpack.c.bf16 %v699_v21, %v691_v19  ;;  %2266 = vmatpush3.bf16.msra.mxu0 %v2445_v15  ;;  %v789_v31 = vpack.c.bf16 %v701_v25, %v693_v24  ;;  %2330 = vmatpush3.bf16.msra.mxu1 %v2447_v18  ;;  %v706_v42 = vmax.f32 %v258_v26, 0.0  ;;  %v708_v46 = vmax.f32 %v371_v29, 0.0 }
 0x103   :  { %v260_v32 = vpop.f32.mrf.mxu0  ;;  %v373_v34 = vpop.f32.mrf.mxu1 }
 0x104   :  { %1442 = vmatprep.mubr.bf16.mxu0 %v787_v28  ;;  %1539 = vmatprep.mubr.bf16.mxu1 %v789_v31  ;;  %v707_v39 = vmax.f32 %v260_v32, 0.0  ;;  %v709_v43 = vmax.f32 %v373_v34, 0.0 }
 0x105   :  { %v262_v35 = vpop.f32.mrf.mxu0  ;;  %1443 = vmatmul.mubr.bf16.gmra.mxu0 %v786_v30  ;;  %v375_v36 = vpop.f32.mrf.mxu1  ;;  %1540 = vmatmul.mubr.bf16.gmra.mxu1 %v788_v33 }
 0x106   :  { %v714_v37 = vmax.f32 %v262_v35, 0.0  ;;  %v716_v40 = vmax.f32 %v375_v36, 0.0 }
 0x107   :  { %v264_v38 = vpop.f32.mrf.mxu0  ;;  %v377_v0 = vpop.f32.mrf.mxu1 }
 0x108   :  { %v715_v41 = vmax.f32 %v264_v38, 0.0  ;;  %v717_v44 = vmax.f32 %v377_v0, 0.0  ;;  %v794_v49 = vpack.c.bf16 %v714_v37, %v706_v42  ;;  %v796_v52 = vpack.c.bf16 %v716_v40, %v708_v46 }
 0x109   :  { %v268_v45 = vpop.f32.mrf.mxu0  ;;  %v381_v48 = vpop.f32.mrf.mxu1 }
 0x10a   :  { %v795_v47 = vpack.c.bf16 %v715_v41, %v707_v39  ;;  %v797_v50 = vpack.c.bf16 %v717_v44, %v709_v43  ;;  %v722_v62 = vmax.f32 %v268_v45, 0.0  ;;  %v724_v3 = vmax.f32 %v381_v48, 0.0 }
 0x10b   :  { %v270_v51 = vpop.f32.mrf.mxu0  ;;  %v383_v53 = vpop.f32.mrf.mxu1 }
 0x10c   :  { %1450 = vmatprep.mubr.bf16.mxu0 %v795_v47  ;;  %1547 = vmatprep.mubr.bf16.mxu1 %v797_v50  ;;  %v723_v58 = vmax.f32 %v270_v51, 0.0  ;;  %v725_v63 = vmax.f32 %v383_v53, 0.0 }
 0x10d   :  { %v272_v54 = vpop.f32.mrf.mxu0  ;;  %1451 = vmatmul.mubr.bf16.gmra.mxu0 %v794_v49  ;;  %v385_v55 = vpop.f32.mrf.mxu1  ;;  %1548 = vmatmul.mubr.bf16.gmra.mxu1 %v796_v52 }
 0x10e   :  { %v730_v56 = vmax.f32 %v272_v54, 0.0  ;;  %v732_v59 = vmax.f32 %v385_v55, 0.0 }
 0x10f   :  { %v274_v57 = vpop.f32.mrf.mxu0  ;;  %v387_v61 = vpop.f32.mrf.mxu1 }
 0x110   :  { %v731_v60 = vmax.f32 %v274_v57, 0.0  ;;  %v733_v1 = vmax.f32 %v387_v61, 0.0  ;;  %v802_v6 = vpack.c.bf16 %v730_v56, %v722_v62  ;;  %v804_v9 = vpack.c.bf16 %v732_v59, %v724_v3 }
 0x111   :  { %v278_v2 = vpop.f32.mrf.mxu0  ;;  %v391_v5 = vpop.f32.mrf.mxu1 }
 0x112   :  { %v803_v4 = vpack.c.bf16 %v731_v60, %v723_v58  ;;  %v805_v7 = vpack.c.bf16 %v733_v1, %v725_v63  ;;  %v738_v19 = vmax.f32 %v278_v2, 0.0  ;;  %v740_v23 = vmax.f32 %v391_v5, 0.0 }
 0x113   :  { %v280_v8 = vpop.f32.mrf.mxu0  ;;  %v393_v10 = vpop.f32.mrf.mxu1 }
 0x114   :  { %1458 = vmatprep.mubr.bf16.mxu0 %v803_v4  ;;  %1555 = vmatprep.mubr.bf16.mxu1 %v805_v7  ;;  %v739_v15 = vmax.f32 %v280_v8, 0.0  ;;  %v741_v20 = vmax.f32 %v393_v10, 0.0 }
 0x115   :  { %v282_v11 = vpop.f32.mrf.mxu0  ;;  %1459 = vmatmul.mubr.bf16.gmra.mxu0 %v802_v6  ;;  %v395_v12 = vpop.f32.mrf.mxu1  ;;  %1556 = vmatmul.mubr.bf16.gmra.mxu1 %v804_v9 }
 0x116   :  { %v746_v13 = vmax.f32 %v282_v11, 0.0  ;;  %v748_v16 = vmax.f32 %v395_v12, 0.0 }
 0x117   :  { %v284_v14 = vpop.f32.mrf.mxu0  ;;  %v397_v18 = vpop.f32.mrf.mxu1 }
 0x118   :  { %v747_v17 = vmax.f32 %v284_v14, 0.0  ;;  %v749_v21 = vmax.f32 %v397_v18, 0.0  ;;  %v810_v26 = vpack.c.bf16 %v746_v13, %v738_v19  ;;  %v812_v29 = vpack.c.bf16 %v748_v16, %v740_v23 }
 0x119   :  { %v434_v22 = vpop.f32.mrf.mxu0  ;;  %v547_v25 = vpop.f32.mrf.mxu1 }
 0x11a   :  { %v811_v24 = vpack.c.bf16 %v747_v17, %v739_v15  ;;  %v813_v27 = vpack.c.bf16 %v749_v21, %v741_v20  ;;  %v630_v39 = vmax.f32 %v434_v22, 0.0  ;;  %v632_v42 = vmax.f32 %v547_v25, 0.0 }
 0x11b   :  { %v436_v28 = vpop.f32.mrf.mxu0  ;;  %v549_v30 = vpop.f32.mrf.mxu1 }
 0x11c   :  { %1466 = vmatprep.mubr.bf16.mxu0 %v811_v24  ;;  %1563 = vmatprep.mubr.bf16.mxu1 %v813_v27  ;;  %v631_v35 = vmax.f32 %v436_v28, 0.0  ;;  %v633_v40 = vmax.f32 %v549_v30, 0.0 }
 0x11d   :  { %v438_v31 = vpop.f32.mrf.mxu0  ;;  %1467 = vmatmul.mubr.bf16.gmra.mxu0 %v810_v26  ;;  %v551_v32 = vpop.f32.mrf.mxu1  ;;  %1564 = vmatmul.mubr.bf16.gmra.mxu1 %v812_v29 }
 0x11e   :  { %v638_v33 = vmax.f32 %v438_v31, 0.0  ;;  %v640_v36 = vmax.f32 %v551_v32, 0.0 }
 0x11f   :  { %v440_v34 = vpop.f32.mrf.mxu0  ;;  %v553_v38 = vpop.f32.mrf.mxu1 }
 0x120   :  { %v639_v37 = vmax.f32 %v440_v34, 0.0  ;;  %v641_v41 = vmax.f32 %v553_v38, 0.0  ;;  %v758_v45 = vpack.c.bf16 %v638_v33, %v630_v39  ;;  %v760_v48 = vpack.c.bf16 %v640_v36, %v632_v42 }
 0x121   :  { %v444_v0 = vpop.f32.mrf.mxu0  ;;  %v557_v44 = vpop.f32.mrf.mxu1 }
 0x122   :  { %v759_v43 = vpack.c.bf16 %v639_v37, %v631_v35  ;;  %v761_v46 = vpack.c.bf16 %v641_v41, %v633_v40  ;;  %v648_v54 = vmax.f32 %v557_v44, 0.0  ;;  %v646_v59 = vmax.f32 %v444_v0, 0.0 }
 0x123   :  { %v446_v47 = vpop.f32.mrf.mxu0  ;;  %v559_v49 = vpop.f32.mrf.mxu1 }
 0x124   :  { %1604 = vmatprep.mubr.bf16.mxu0 %v759_v43  ;;  %1701 = vmatprep.mubr.bf16.mxu1 %v761_v46  ;;  %v647_v55 = vmax.f32 %v446_v47, 0.0  ;;  %v649_v60 = vmax.f32 %v559_v49, 0.0 }
 0x125   :  { %v448_v50 = vpop.f32.mrf.mxu0  ;;  %1605 = vmatmul.mubr.bf16.vlgmr.msra.gmra.mxu0 %v758_v45  ;;  %v561_v51 = vpop.f32.mrf.mxu1  ;;  %1702 = vmatmul.mubr.bf16.vlgmr.msra.gmra.mxu1 %v760_v48 }
 0x126   :  { %v654_v52 = vmax.f32 %v448_v50, 0.0  ;;  %v656_v56 = vmax.f32 %v561_v51, 0.0 }
 0x127   :  { %v450_v53 = vpop.f32.mrf.mxu0  ;;  %v563_v58 = vpop.f32.mrf.mxu1 }
 0x128   :  { %v655_v57 = vmax.f32 %v450_v53, 0.0  ;;  %v657_v61 = vmax.f32 %v563_v58, 0.0  ;;  %v766_v2 = vpack.c.bf16 %v654_v52, %v646_v59  ;;  %v768_v5 = vpack.c.bf16 %v656_v56, %v648_v54 }
 0x129   :  { %v454_v62 = vpop.f32.mrf.mxu0  ;;  %v567_v1 = vpop.f32.mrf.mxu1 }
 0x12a   :  { %v767_v63 = vpack.c.bf16 %v655_v57, %v647_v55  ;;  %v769_v3 = vpack.c.bf16 %v657_v61, %v649_v60  ;;  %v664_v11 = vmax.f32 %v567_v1, 0.0  ;;  %v662_v16 = vmax.f32 %v454_v62, 0.0 }
 0x12b   :  { %v456_v4 = vpop.f32.mrf.mxu0  ;;  %v569_v6 = vpop.f32.mrf.mxu1 }
 0x12c   :  { %1612 = vmatprep.mubr.bf16.mxu0 %v767_v63  ;;  %1709 = vmatprep.mubr.bf16.mxu1 %v769_v3  ;;  %v663_v12 = vmax.f32 %v456_v4, 0.0  ;;  %v665_v17 = vmax.f32 %v569_v6, 0.0 }
 0x12d   :  { %v458_v7 = vpop.f32.mrf.mxu0  ;;  %1613 = vmatmul.mubr.bf16.gmra.mxu0 %v766_v2  ;;  %v571_v8 = vpop.f32.mrf.mxu1  ;;  %1710 = vmatmul.mubr.bf16.gmra.mxu1 %v768_v5 }
 0x12e   :  { %v670_v9 = vmax.f32 %v458_v7, 0.0  ;;  %v672_v13 = vmax.f32 %v571_v8, 0.0 }
 0x12f   :  { %v460_v10 = vpop.f32.mrf.mxu0  ;;  %v573_v15 = vpop.f32.mrf.mxu1 }
 0x130   :  { %v671_v14 = vmax.f32 %v460_v10, 0.0  ;;  %v673_v18 = vmax.f32 %v573_v15, 0.0  ;;  %v774_v22 = vpack.c.bf16 %v670_v9, %v662_v16  ;;  %v776_v25 = vpack.c.bf16 %v672_v13, %v664_v11 }
 0x131   :  { %v464_v19 = vpop.f32.mrf.mxu0  ;;  %v577_v21 = vpop.f32.mrf.mxu1 }
 0x132   :  { %v775_v20 = vpack.c.bf16 %v671_v14, %v663_v12  ;;  %v777_v23 = vpack.c.bf16 %v673_v18, %v665_v17  ;;  %v680_v31 = vmax.f32 %v577_v21, 0.0  ;;  %v678_v36 = vmax.f32 %v464_v19, 0.0 }
 0x133   :  { %v466_v24 = vpop.f32.mrf.mxu0  ;;  %v579_v26 = vpop.f32.mrf.mxu1 }
 0x134   :  { %1620 = vmatprep.mubr.bf16.mxu0 %v775_v20  ;;  %1717 = vmatprep.mubr.bf16.mxu1 %v777_v23  ;;  %v679_v32 = vmax.f32 %v466_v24, 0.0  ;;  %v681_v37 = vmax.f32 %v579_v26, 0.0 }
 0x135   :  { %v468_v27 = vpop.f32.mrf.mxu0  ;;  %1621 = vmatmul.mubr.bf16.gmra.mxu0 %v774_v22  ;;  %v581_v28 = vpop.f32.mrf.mxu1  ;;  %1718 = vmatmul.mubr.bf16.gmra.mxu1 %v776_v25 }
 0x136   :  { %v686_v29 = vmax.f32 %v468_v27, 0.0  ;;  %v688_v33 = vmax.f32 %v581_v28, 0.0 }
 0x137   :  { %v470_v30 = vpop.f32.mrf.mxu0  ;;  %v583_v35 = vpop.f32.mrf.mxu1 }
 0x138   :  { %v687_v34 = vmax.f32 %v470_v30, 0.0  ;;  %v689_v38 = vmax.f32 %v583_v35, 0.0  ;;  %v782_v0 = vpack.c.bf16 %v686_v29, %v678_v36  ;;  %v784_v44 = vpack.c.bf16 %v688_v33, %v680_v31 }
 0x139   :  { %v474_v39 = vpop.f32.mrf.mxu0  ;;  %v587_v41 = vpop.f32.mrf.mxu1 }
 0x13a   :  { %v783_v40 = vpack.c.bf16 %v687_v34, %v679_v32  ;;  %v785_v42 = vpack.c.bf16 %v689_v38, %v681_v37  ;;  %v696_v50 = vmax.f32 %v587_v41, 0.0  ;;  %v694_v55 = vmax.f32 %v474_v39, 0.0 }
 0x13b   :  { %v476_v43 = vpop.f32.mrf.mxu0  ;;  %v589_v45 = vpop.f32.mrf.mxu1 }
 0x13c   :  { %1628 = vmatprep.mubr.bf16.mxu0 %v783_v40  ;;  %1725 = vmatprep.mubr.bf16.mxu1 %v785_v42  ;;  %v695_v51 = vmax.f32 %v476_v43, 0.0  ;;  %v697_v56 = vmax.f32 %v589_v45, 0.0 }
 0x13d   :  { %v478_v46 = vpop.f32.mrf.mxu0  ;;  %1629 = vmatmul.mubr.bf16.gmra.mxu0 %v782_v0  ;;  %v591_v47 = vpop.f32.mrf.mxu1  ;;  %1726 = vmatmul.mubr.bf16.gmra.mxu1 %v784_v44 }
 0x13e   :  { %v702_v48 = vmax.f32 %v478_v46, 0.0  ;;  %v704_v52 = vmax.f32 %v591_v47, 0.0 }
 0x13f   :  { %v480_v49 = vpop.f32.mrf.mxu0  ;;  %v593_v54 = vpop.f32.mrf.mxu1 }
 0x140   :  { %v703_v53 = vmax.f32 %v480_v49, 0.0  ;;  %v705_v57 = vmax.f32 %v593_v54, 0.0  ;;  %v790_v61 = vpack.c.bf16 %v702_v48, %v694_v55  ;;  %v792_v1 = vpack.c.bf16 %v704_v52, %v696_v50 }
 0x141   :  { %v484_v58 = vpop.f32.mrf.mxu0  ;;  %v597_v60 = vpop.f32.mrf.mxu1 }
 0x142   :  { %v791_v59 = vpack.c.bf16 %v703_v53, %v695_v51  ;;  %v793_v62 = vpack.c.bf16 %v705_v57, %v697_v56  ;;  %v712_v7 = vmax.f32 %v597_v60, 0.0  ;;  %v710_v12 = vmax.f32 %v484_v58, 0.0 }
 0x143   :  { %v486_v63 = vpop.f32.mrf.mxu0  ;;  %v599_v2 = vpop.f32.mrf.mxu1 }
 0x144   :  { %1636 = vmatprep.mubr.bf16.mxu0 %v791_v59  ;;  %1733 = vmatprep.mubr.bf16.mxu1 %v793_v62  ;;  %v711_v8 = vmax.f32 %v486_v63, 0.0  ;;  %v713_v13 = vmax.f32 %v599_v2, 0.0 }
 0x145   :  { %v488_v3 = vpop.f32.mrf.mxu0  ;;  %1637 = vmatmul.mubr.bf16.gmra.mxu0 %v790_v61  ;;  %v601_v4 = vpop.f32.mrf.mxu1  ;;  %1734 = vmatmul.mubr.bf16.gmra.mxu1 %v792_v1 }
 0x146   :  { %v718_v5 = vmax.f32 %v488_v3, 0.0  ;;  %v720_v9 = vmax.f32 %v601_v4, 0.0 }
 0x147   :  { %v490_v6 = vpop.f32.mrf.mxu0  ;;  %v603_v11 = vpop.f32.mrf.mxu1 }
 0x148   :  { %v719_v10 = vmax.f32 %v490_v6, 0.0  ;;  %v721_v14 = vmax.f32 %v603_v11, 0.0  ;;  %v798_v18 = vpack.c.bf16 %v718_v5, %v710_v12  ;;  %v800_v21 = vpack.c.bf16 %v720_v9, %v712_v7  ;;  %v980_v5 = vld [vmem:[#allocation2 + $0x10] sm:$0xff] }
 0x149   :  { %v494_v15 = vpop.f32.mrf.mxu0  ;;  %v607_v17 = vpop.f32.mrf.mxu1 }
 0x14a   :  { %v799_v16 = vpack.c.bf16 %v719_v10, %v711_v8  ;;  %v801_v19 = vpack.c.bf16 %v721_v14, %v713_v13  ;;  %v728_v27 = vmax.f32 %v607_v17, 0.0  ;;  %v726_v32 = vmax.f32 %v494_v15, 0.0  ;;  %v981_v13 = vld [vmem:[#allocation2 + $0x18] sm:$0xff] }
 0x14b   :  { %v496_v20 = vpop.f32.mrf.mxu0  ;;  %v609_v22 = vpop.f32.mrf.mxu1 }
 0x14c   :  { %1644 = vmatprep.mubr.bf16.mxu0 %v799_v16  ;;  %1741 = vmatprep.mubr.bf16.mxu1 %v801_v19  ;;  %v727_v28 = vmax.f32 %v496_v20, 0.0  ;;  %v729_v33 = vmax.f32 %v609_v22, 0.0 }
 0x14d   :  { %v498_v23 = vpop.f32.mrf.mxu0  ;;  %1645 = vmatmul.mubr.bf16.gmra.mxu0 %v798_v18  ;;  %v611_v24 = vpop.f32.mrf.mxu1  ;;  %1742 = vmatmul.mubr.bf16.gmra.mxu1 %v800_v21 }
 0x14e   :  { %v734_v25 = vmax.f32 %v498_v23, 0.0  ;;  %v736_v29 = vmax.f32 %v611_v24, 0.0 }
 0x14f   :  { %v500_v26 = vpop.f32.mrf.mxu0  ;;  %v613_v31 = vpop.f32.mrf.mxu1 }
 0x150   :  { %v735_v30 = vmax.f32 %v500_v26, 0.0  ;;  %v737_v34 = vmax.f32 %v613_v31, 0.0  ;;  %v806_v38 = vpack.c.bf16 %v734_v25, %v726_v32  ;;  %v808_v41 = vpack.c.bf16 %v736_v29, %v728_v27  ;;  %v983_v27 = vld [vmem:[#allocation2 + $0x28] sm:$0xff] }
 0x151   :  { %v504_v35 = vpop.f32.mrf.mxu0  ;;  %v617_v37 = vpop.f32.mrf.mxu1 }
 0x152   :  { %v807_v36 = vpack.c.bf16 %v735_v30, %v727_v28  ;;  %v809_v39 = vpack.c.bf16 %v737_v34, %v729_v33  ;;  %v744_v46 = vmax.f32 %v617_v37, 0.0  ;;  %v742_v51 = vmax.f32 %v504_v35, 0.0 }
 0x153   :  { %v506_v40 = vpop.f32.mrf.mxu0  ;;  %v619_v0 = vpop.f32.mrf.mxu1 }
 0x154   :  { %1652 = vmatprep.mubr.bf16.mxu0 %v807_v36  ;;  %1749 = vmatprep.mubr.bf16.mxu1 %v809_v39  ;;  %v743_v47 = vmax.f32 %v506_v40, 0.0  ;;  %v745_v52 = vmax.f32 %v619_v0, 0.0  ;;  %v985_v40 = vld [vmem:[#allocation2 + $0x38] sm:$0xff] }
 0x155   :  { %v508_v42 = vpop.f32.mrf.mxu0  ;;  %1653 = vmatmul.mubr.bf16.gmra.mxu0 %v806_v38  ;;  %v621_v43 = vpop.f32.mrf.mxu1  ;;  %1750 = vmatmul.mubr.bf16.gmra.mxu1 %v808_v41 }
 0x156   :  { %v750_v44 = vmax.f32 %v508_v42, 0.0  ;;  %v752_v48 = vmax.f32 %v621_v43, 0.0 }
 0x157   :  { %v510_v45 = vpop.f32.mrf.mxu0  ;;  %v623_v50 = vpop.f32.mrf.mxu1 }
 0x158   :  { %v751_v49 = vmax.f32 %v510_v45, 0.0  ;;  %v753_v53 = vmax.f32 %v623_v50, 0.0  ;;  %v814_v55 = vpack.c.bf16 %v750_v44, %v742_v51  ;;  %v816_v57 = vpack.c.bf16 %v752_v48, %v744_v46 }
 0x15a   :  { %v815_v54 = vpack.c.bf16 %v751_v49, %v743_v47  ;;  %v817_v56 = vpack.c.bf16 %v753_v53, %v745_v52  ;;  %v987_v52 = vld [vmem:[#allocation2 + $0x48] sm:$0xff] }
 0x15c   :  { %1660 = vmatprep.mubr.bf16.mxu0 %v815_v54  ;;  %1757 = vmatprep.mubr.bf16.mxu1 %v817_v56 }
 0x15d   :  { %1661 = vmatmul.mubr.bf16.gmra.mxu0 %v814_v55  ;;  %1758 = vmatmul.mubr.bf16.gmra.mxu1 %v816_v57 }
 0x1a5   :  { %v2754_v58 = vpop.f32.mrf.mxu0  ;;  %v2756_v59 = vpop.f32.mrf.mxu1 }
 0x1a7   :  { %v2758_v60 = vpop.f32.mrf.mxu0  ;;  %v2760_v61 = vpop.f32.mrf.mxu1 }
 0x1a9   :  { %v2762_v62 = vpop.f32.mrf.mxu0  ;;  %v2764_v63 = vpop.f32.mrf.mxu1 }
 0x1ab   :  { %v2766_v1 = vpop.f32.mrf.mxu0  ;;  %v2768_v2 = vpop.f32.mrf.mxu1 }
 0x1ad   :  { %v2145_v3 = vpop.f32.mrf.mxu0  ;;  %v2209_v4 = vpop.f32.mrf.mxu1 }
 0x1af   :  { %v2146_v6 = vpop.f32.mrf.mxu0  ;;  %v2210_v8 = vpop.f32.mrf.mxu1 }
 0x1b0   :  { %v2147_v7 = vadd.f32 %v2146_v6, %v2145_v3  ;;  %v2211_v11 = vadd.f32 %v2210_v8, %v2209_v4 }
 0x1b1   :  { %v2148_v9 = vpop.f32.mrf.mxu0  ;;  %v2212_v12 = vpop.f32.mrf.mxu1 }
 0x1b2   :  { %v1421_v10 = vadd.f32 %v2147_v7, %v980_v5 }
 0x1b3   :  { %v2149_v14 = vpop.f32.mrf.mxu0  ;;  %v2213_v17 = vpop.f32.mrf.mxu1 }
 0x1b4   :  { %v2770_v15 = vadd.f32 %v2211_v11, %v1421_v10  ;;  %v2150_v16 = vadd.f32 %v2149_v14, %v2148_v9  ;;  %v2214_v20 = vadd.f32 %v2213_v17, %v2212_v12  ;;  %v989_v10 = vld [vmem:[#allocation2 + $0x58] sm:$0xff] }
 0x1b5   :  { %v2772_v18 = vpop.f32.mrf.mxu0  ;;  %v2774_v21 = vpop.f32.mrf.mxu1 }
 0x1b6   :  { %v1424_v19 = vadd.f32 %v2150_v16, %v981_v13 }
 0x1b7   :  { %v2776_v22 = vpop.f32.mrf.mxu0  ;;  %v2780_v24 = vpop.f32.mrf.mxu1 }
 0x1b8   :  { %v2778_v23 = vadd.f32 %v2214_v20, %v1424_v19 }
 0x1b9   :  { %v2154_v25 = vpop.f32.mrf.mxu0  ;;  %v2218_v26 = vpop.f32.mrf.mxu1 }
 0x1bb   :  { %v2155_v28 = vpop.f32.mrf.mxu0  ;;  %v2219_v30 = vpop.f32.mrf.mxu1 }
 0x1bc   :  { %v2156_v29 = vadd.f32 %v2155_v28, %v2154_v25  ;;  %v2220_v33 = vadd.f32 %v2219_v30, %v2218_v26 }
 0x1bd   :  { %v2782_v31 = vpop.f32.mrf.mxu0  ;;  %v2784_v34 = vpop.f32.mrf.mxu1 }
 0x1be   :  { %v1432_v32 = vadd.f32 %v2156_v29, %v983_v27  ;;  %v991_v29 = vld [vmem:[#allocation2 + $0x68] sm:$0xff] }
 0x1bf   :  { %v2786_v35 = vpop.f32.mrf.mxu0  ;;  %v2790_v37 = vpop.f32.mrf.mxu1 }
 0x1c0   :  { %v2788_v36 = vadd.f32 %v2220_v33, %v1432_v32 }
 0x1c1   :  { %v2160_v38 = vpop.f32.mrf.mxu0  ;;  %v2224_v39 = vpop.f32.mrf.mxu1 }
 0x1c3   :  { %v2161_v41 = vpop.f32.mrf.mxu0  ;;  %v2225_v42 = vpop.f32.mrf.mxu1 }
 0x1c4   :  { %v2162_v0 = vadd.f32 %v2161_v41, %v2160_v38  ;;  %v2226_v45 = vadd.f32 %v2225_v42, %v2224_v39  ;;  %v2141_v42 = vadd.f32 %v2758_v60, %v2754_v58  ;;  %v2205_v58 = vadd.f32 %v2760_v61, %v2756_v59 }
 0x1c5   :  { %v2792_v43 = vpop.f32.mrf.mxu0  ;;  %v2794_v46 = vpop.f32.mrf.mxu1 }
 0x1c6   :  { %v1440_v44 = vadd.f32 %v2162_v0, %v985_v40 }
 0x1c7   :  { %v2796_v47 = vpop.f32.mrf.mxu0  ;;  %v2800_v49 = vpop.f32.mrf.mxu1 }
 0x1c8   :  { %v2798_v48 = vadd.f32 %v2226_v45, %v1440_v44 }
 0x1c9   :  { %v2166_v50 = vpop.f32.mrf.mxu0  ;;  %v2230_v51 = vpop.f32.mrf.mxu1 }
 0x1cb   :  { %v2167_v53 = vpop.f32.mrf.mxu0  ;;  %v2231_v55 = vpop.f32.mrf.mxu1 }
 0x1cc   :  { %v2168_v54 = vadd.f32 %v2167_v53, %v2166_v50  ;;  %v2232_v3 = vadd.f32 %v2231_v55, %v2230_v51  ;;  %v978_v50 = vld [vmem:[#allocation2] sm:$0xff]  ;;  %v993_v53 = vld [vmem:[#allocation2 + $0x78] sm:$0xff] }
 0x1cd   :  { %v2802_v56 = vpop.f32.mrf.mxu0  ;;  %v2804_v4 = vpop.f32.mrf.mxu1  ;;  %v1413_v55 = vadd.f32 %v2141_v42, %v978_v50 }
 0x1ce   :  { %v1448_v57 = vadd.f32 %v2168_v54, %v987_v52 }
 0x1cf   :  { %v2806_v5 = vpop.f32.mrf.mxu0  ;;  %v2810_v7 = vpop.f32.mrf.mxu1 }
 0x1d0   :  { %v2808_v6 = vadd.f32 %v2232_v3, %v1448_v57  ;;  %v2144_v57 = vadd.f32 %v2766_v1, %v2762_v62  ;;  %v2208_v62 = vadd.f32 %v2768_v2, %v2764_v63  ;;  %v982_v63 = vld [vmem:[#allocation2 + $0x20] sm:$0xff] }
 0x1d1   :  { %v2172_v8 = vpop.f32.mrf.mxu0  ;;  %v2236_v9 = vpop.f32.mrf.mxu1 }
 0x1d3   :  { %v2173_v11 = vpop.f32.mrf.mxu0  ;;  %v2237_v13 = vpop.f32.mrf.mxu1 }
 0x1d4   :  { %v2174_v12 = vadd.f32 %v2173_v11, %v2172_v8  ;;  %v2238_v17 = vadd.f32 %v2237_v13, %v2236_v9  ;;  %v979_v9 = vld [vmem:[#allocation2 + $0x8] sm:$0xff] }
 0x1d5   :  { %v2812_v14 = vpop.f32.mrf.mxu0  ;;  %v2814_v19 = vpop.f32.mrf.mxu1 }
 0x1d6   :  { %v1456_v16 = vadd.f32 %v2174_v12, %v989_v10 }
 0x1d7   :  { %v2816_v20 = vpop.f32.mrf.mxu0  ;;  %v2820_v26 = vpop.f32.mrf.mxu1 }
 0x1d8   :  { %v2818_v25 = vadd.f32 %v2238_v17, %v1456_v16  ;;  %v1510_v16 = vadd.f32 %v2205_v58, %v1413_v55  ;;  %v1416_v17 = vadd.f32 %v2144_v57, %v979_v9 }
 0x1d9   :  { %v2178_v27 = vpop.f32.mrf.mxu0  ;;  %v2242_v28 = vpop.f32.mrf.mxu1 }
 0x1db   :  { %v2179_v30 = vpop.f32.mrf.mxu0  ;;  %v2243_v33 = vpop.f32.mrf.mxu1 }
 0x1dc   :  { %v2180_v32 = vadd.f32 %v2179_v30, %v2178_v27  ;;  %v2244_v40 = vadd.f32 %v2243_v33, %v2242_v28 }
 0x1dd   :  { %v2822_v38 = vpop.f32.mrf.mxu0  ;;  %v2824_v41 = vpop.f32.mrf.mxu1 }
 0x1de   :  { %v1464_v39 = vadd.f32 %v2180_v32, %v991_v29 }
 0x1df   :  { %v2826_v0 = vpop.f32.mrf.mxu0  ;;  %v2832_v45 = vpop.f32.mrf.mxu1 }
 0x1e0   :  { %v2830_v44 = vadd.f32 %v2244_v40, %v1464_v39  ;;  %v1513_v40 = vadd.f32 %v2208_v62, %v1416_v17  ;;  %v2217_v17 = vadd.f32 %v2780_v24, %v2774_v21  ;;  %v984_v21 = vld [vmem:[#allocation2 + $0x30] sm:$0xff] }
 0x1e1   :  { %v2184_v51 = vpop.f32.mrf.mxu0  ;;  %v2248_v52 = vpop.f32.mrf.mxu1 }
 0x1e3   :  { %v2185_v54 = vpop.f32.mrf.mxu0  ;;  %v2249_v8 = vpop.f32.mrf.mxu1 }
 0x1e4   :  { %v2186_v3 = vadd.f32 %v2185_v54, %v2184_v51  ;;  %v2250_v11 = vadd.f32 %v2249_v8, %v2248_v52  ;;  %v2153_v54 = vadd.f32 %v2776_v22, %v2772_v18 }
 0x1e5   :  { %v2267_v10 = vpop.f32.mrf.mxu0  ;;  %v2331_v12 = vpop.f32.mrf.mxu1 }
 0x1e6   :  { %v1472_v60 = vadd.f32 %v2186_v3, %v993_v53 }
 0x1e7   :  { %v2268_v13 = vpop.f32.mrf.mxu0  ;;  %v2332_v29 = vpop.f32.mrf.mxu1 }
 0x1e8   :  { %v2838_v27 = vadd.f32 %v2250_v11, %v1472_v60  ;;  %v2269_v28 = vadd.f32 %v2268_v13, %v2267_v10  ;;  %v2333_v32 = vadd.f32 %v2332_v29, %v2331_v12  ;;  %v1429_v12 = vadd.f32 %v2153_v54, %v982_v63 }
 0x1e9   :  { %v2270_v30 = vpop.f32.mrf.mxu0  ;;  %v2334_v33 = vpop.f32.mrf.mxu1 }
 0x1ea   :  { %v1607_v1 = vadd.f32 %v2269_v28, %v1510_v16 }
 0x1eb   :  { %v2271_v39 = vpop.f32.mrf.mxu0  ;;  %v2335_v42 = vpop.f32.mrf.mxu1 }
 0x1ec   :  { %v2842_v59 = vadd.f32 %v2333_v32, %v1607_v1  ;;  %v2272_v61 = vadd.f32 %v2271_v39, %v2270_v30  ;;  %v2336_v52 = vadd.f32 %v2335_v42, %v2334_v33  ;;  %v1526_v30 = vadd.f32 %v2217_v17, %v1429_v12 }
 0x1ed   :  { %v2273_v50 = vpop.f32.mrf.mxu0  ;;  %v2337_v53 = vpop.f32.mrf.mxu1  ;;  %v2159_v1 = vadd.f32 %v2786_v35, %v2782_v31 }
 0x1ee   :  { %v1610_v51 = vadd.f32 %v2272_v61, %v1513_v40  ;;  %1766 = vadd.xlane.f32.xlu0 %v2842_v59  ;;  %v1814_v8 = vmul.f32 %v2842_v59, %v2842_v59 }
 0x1ef   :  { %v2274_v55 = vpop.f32.mrf.mxu0  ;;  %v2338_v3 = vpop.f32.mrf.mxu1 }
 0x1f0   :  { %v2847_v2 = vadd.f32 %v2336_v52, %v1610_v51  ;;  %v2275_v57 = vadd.f32 %v2274_v55, %v2273_v50  ;;  %v2339_v58 = vadd.f32 %v2338_v3, %v2337_v53  ;;  %v1437_v52 = vadd.f32 %v2159_v1, %v984_v21 }
 0x1f1   :  { %v2276_v9 = vpop.f32.mrf.mxu0  ;;  %v2340_v60 = vpop.f32.mrf.mxu1  ;;  %v2223_v55 = vadd.f32 %v2790_v37, %v2784_v34 }
 0x1f2   :  { %v1615_v10 = vadd.f32 %v2275_v57, %v2770_v15  ;;  %1830 = vadd.xlane.f32.xlu0 %v1814_v8  ;;  %v1815_v11 = vmul.f32 %v2847_v2, %v2847_v2  ;;  %v2165_v8 = vadd.f32 %v2796_v47, %v2792_v43 }
 0x1f3   :  { %v2277_v18 = vpop.f32.mrf.mxu0  ;;  %v2341_v16 = vpop.f32.mrf.mxu1 }
 0x1f4   :  { %v2854_v22 = vadd.f32 %v2339_v58, %v1615_v10  ;;  %v2278_v13 = vadd.f32 %v2277_v18, %v2276_v9  ;;  %1832 = vadd.xlane.f32.xlu1 %v1815_v11  ;;  %v2342_v32 = vadd.f32 %v2341_v16, %v2340_v60  ;;  %v1534_v10 = vadd.f32 %v2223_v55, %v1437_v52  ;;  %v986_v58 = vld [vmem:[#allocation2 + $0x40] sm:$0xff] }
 0x1f5   :  { %v2279_v28 = vpop.f32.mrf.mxu0  ;;  %v2343_v15 = vpop.f32.mrf.mxu1  ;;  %v1445_v17 = vadd.f32 %v2165_v8, %v986_v58 }
 0x1f6   :  { %v1618_v29 = vadd.f32 %v2278_v13, %v2778_v23  ;;  %1768 = vadd.xlane.f32.xlu0 %v2847_v2  ;;  %v1816_v40 = vmul.f32 %v2854_v22, %v2854_v22 }
 0x1f7   :  { %v2280_v62 = vpop.f32.mrf.mxu0  ;;  %v2344_v39 = vpop.f32.mrf.mxu1 }
 0x1f8   :  { %v2281_v33 = vadd.f32 %v2280_v62, %v2279_v28  ;;  %1770 = vadd.xlane.f32.xlu1 %v2854_v22  ;;  %v2865_v61 = vadd.f32 %v2342_v32, %v1618_v29  ;;  %v2345_v42 = vadd.f32 %v2344_v39, %v2343_v15  ;;  %v2229_v15 = vadd.f32 %v2800_v49, %v2794_v46  ;;  %v988_v49 = vld [vmem:[#allocation2 + $0x50] sm:$0xff] }
 0x1f9   :  { %v2282_v24 = vpop.f32.mrf.mxu0  ;;  %v2346_v50 = vpop.f32.mrf.mxu1 }
 0x1fa   :  { %v1623_v23 = vadd.f32 %v2281_v33, %v1526_v30  ;;  %1834 = vadd.xlane.f32.xlu0 %v1816_v40  ;;  %v1817_v3 = vmul.f32 %v2865_v61, %v2865_v61  ;;  %v1542_v33 = vadd.f32 %v2229_v15, %v1445_v17  ;;  %v2171_v40 = vadd.f32 %v2806_v5, %v2802_v56 }
 0x1fb   :  { %v2283_v51 = vpop.f32.mrf.mxu0  ;;  %v2347_v35 = vpop.f32.mrf.mxu1 }
 0x1fc   :  { %v2867_v53 = vadd.f32 %v2345_v42, %v1623_v23  ;;  %v2284_v31 = vadd.f32 %v2283_v51, %v2282_v24  ;;  %1772 = vadd.xlane.f32.xlu1 %v2865_v61  ;;  %v2348_v60 = vadd.f32 %v2347_v35, %v2346_v50  ;;  %v1453_v35 = vadd.f32 %v2171_v40, %v988_v49 }
 0x1fd   :  { %v2285_v54 = vpop.f32.mrf.mxu0  ;;  %v2349_v57 = vpop.f32.mrf.mxu1 }
 0x1fe   :  { %v1626_v63 = vadd.f32 %v2284_v31, %v2788_v36  ;;  %1774 = vadd.xlane.f32.xlu0 %v2867_v53  ;;  %v1818_v34 = vmul.f32 %v2867_v53, %v2867_v53 }
 0x1ff   :  { %v2286_v9 = vpop.f32.mrf.mxu0  ;;  %v2350_v12 = vpop.f32.mrf.mxu1 }
 0x200   :  { %v2287_v11 = vadd.f32 %v2286_v9, %v2285_v54  ;;  %1836 = vadd.xlane.f32.xlu1 %v1817_v3  ;;  %v2880_v37 = vadd.f32 %v2348_v60, %v1626_v63  ;;  %v2351_v13 = vadd.f32 %v2350_v12, %v2349_v57  ;;  %v2235_v63 = vadd.f32 %v2810_v7, %v2804_v4  ;;  %v990_v60 = vld [vmem:[#allocation2 + $0x60] sm:$0xff] }
 0x201   :  { %v2288_v36 = vpop.f32.mrf.mxu0  ;;  %v2352_v16 = vpop.f32.mrf.mxu1  ;;  %v2177_v9 = vadd.f32 %v2816_v20, %v2812_v14 }
 0x202   :  { %v1631_v18 = vadd.f32 %v2287_v11, %v1534_v10  ;;  %1838 = vadd.xlane.f32.xlu0 %v1818_v34  ;;  %v1819_v32 = vmul.f32 %v2880_v37, %v2880_v37  ;;  %v1550_v58 = vadd.f32 %v2235_v63, %v1453_v35 }
 0x203   :  { %v2289_v28 = vpop.f32.mrf.mxu0  ;;  %v2353_v29 = vpop.f32.mrf.mxu1 }
 0x204   :  { %v2882_v43 = vadd.f32 %v2351_v13, %v1631_v18  ;;  %v2290_v47 = vadd.f32 %v2289_v28, %v2288_v36  ;;  %1776 = vadd.xlane.f32.xlu1 %v2880_v37  ;;  %v2354_v21 = vadd.f32 %v2353_v29, %v2352_v16  ;;  %v1461_v16 = vadd.f32 %v2177_v9, %v990_v60 }
 0x205   :  { %v2291_v30 = vpop.f32.mrf.mxu0  ;;  %v2355_v1 = vpop.f32.mrf.mxu1 }
 0x206   :  { %v1634_v62 = vadd.f32 %v2290_v47, %v2798_v48  ;;  %1778 = vadd.xlane.f32.xlu0 %v2882_v43  ;;  %v1820_v46 = vmul.f32 %v2882_v43, %v2882_v43  ;;  %v2241_v47 = vadd.f32 %v2820_v26, %v2814_v19  ;;  %v992_v26 = vld [vmem:[#allocation2 + $0x70] sm:$0xff] }
 0x207   :  { %v2292_v39 = vpop.f32.mrf.mxu0  ;;  %v2356_v23 = vpop.f32.mrf.mxu1 }
 0x208   :  { %v2293_v24 = vadd.f32 %v2292_v39, %v2291_v30  ;;  %1840 = vadd.xlane.f32.xlu1 %v1819_v32  ;;  %v2895_v42 = vadd.f32 %v2354_v21, %v1634_v62  ;;  %v2357_v51 = vadd.f32 %v2356_v23, %v2355_v1  ;;  %v1558_v1 = vadd.f32 %v2241_v47, %v1461_v16 }
 0x209   :  { %v2294_v48 = vpop.f32.mrf.mxu0  ;;  %v2358_v52 = vpop.f32.mrf.mxu1 }
 0x20a   :  { %v1639_v50 = vadd.f32 %v2293_v24, %v1542_v33  ;;  %1842 = vadd.xlane.f32.xlu0 %v1820_v46  ;;  %v1821_v8 = vmul.f32 %v2895_v42, %v2895_v42  ;;  %v2183_v33 = vadd.f32 %v2826_v0, %v2822_v38 }
 0x20b   :  { %v2295_v31 = vpop.f32.mrf.mxu0  ;;  %v2359_v5 = vpop.f32.mrf.mxu1 }
 0x20c   :  { %v2897_v54 = vadd.f32 %v2357_v51, %v1639_v50  ;;  %v2296_v56 = vadd.f32 %v2295_v31, %v2294_v48  ;;  %1780 = vadd.xlane.f32.xlu1 %v2895_v42  ;;  %v2360_v11 = vadd.f32 %v2359_v5, %v2358_v52  ;;  %v1469_v50 = vadd.f32 %v2183_v33, %v992_v26 }
 0x20d   :  { %v2297_v55 = vpop.f32.mrf.mxu0  ;;  %v2361_v3 = vpop.f32.mrf.mxu1  ;;  %v2247_v31 = vadd.f32 %v2832_v45, %v2824_v41 }
 0x20e   :  { %v1642_v57 = vadd.f32 %v2296_v56, %v2808_v6  ;;  %1782 = vadd.xlane.f32.xlu0 %v2897_v54  ;;  %v1822_v4 = vmul.f32 %v2897_v54, %v2897_v54 }
 0x20f   :  { %v2298_v10 = vpop.f32.mrf.mxu0  ;;  %v2362_v34 = vpop.f32.mrf.mxu1  ;;  %v1566_v63 = vadd.f32 %v2247_v31, %v1469_v50 }
 0x210   :  { %v2299_v12 = vadd.f32 %v2298_v10, %v2297_v55  ;;  %1844 = vadd.xlane.f32.xlu1 %v1821_v8  ;;  %v2910_v7 = vadd.f32 %v2360_v11, %v1642_v57  ;;  %v2363_v18 = vadd.f32 %v2362_v34, %v2361_v3 }
 0x211   :  { %v2300_v6 = vpop.f32.mrf.mxu0  ;;  %v2364_v13 = vpop.f32.mrf.mxu1 }
 0x212   :  { %v1647_v36 = vadd.f32 %v2299_v12, %v1550_v58  ;;  %1846 = vadd.xlane.f32.xlu0 %v1822_v4  ;;  %v1823_v62 = vmul.f32 %v2910_v7, %v2910_v7 }
 0x213   :  { %v2301_v17 = vpop.f32.mrf.mxu0  ;;  %v2365_v28 = vpop.f32.mrf.mxu1 }
 0x214   :  { %v2912_v14 = vadd.f32 %v2363_v18, %v1647_v36  ;;  %v2302_v20 = vadd.f32 %v2301_v17, %v2300_v6  ;;  %1784 = vadd.xlane.f32.xlu1 %v2910_v7  ;;  %v2366_v39 = vadd.f32 %v2365_v28, %v2364_v13 }
 0x215   :  { %v2303_v29 = vpop.f32.mrf.mxu0  ;;  %v2367_v30 = vpop.f32.mrf.mxu1 }
 0x216   :  { %v1650_v15 = vadd.f32 %v2302_v20, %v2818_v25  ;;  %1786 = vadd.xlane.f32.xlu0 %v2912_v14  ;;  %v1824_v19 = vmul.f32 %v2912_v14, %v2912_v14 }
 0x217   :  { %v2304_v32 = vpop.f32.mrf.mxu0  ;;  %v2368_v21 = vpop.f32.mrf.mxu1 }
 0x218   :  { %v2305_v40 = vadd.f32 %v2304_v32, %v2303_v29  ;;  %1848 = vadd.xlane.f32.xlu1 %v1823_v62  ;;  %v2925_v24 = vadd.f32 %v2366_v39, %v1650_v15  ;;  %v2369_v46 = vadd.f32 %v2368_v21, %v2367_v30 }
 0x219   :  { %v2306_v25 = vpop.f32.mrf.mxu0  ;;  %v2370_v49 = vpop.f32.mrf.mxu1 }
 0x21a   :  { %v1655_v23 = vadd.f32 %v2305_v40, %v1558_v1  ;;  %1850 = vadd.xlane.f32.xlu0 %v1824_v19  ;;  %v1825_v5 = vmul.f32 %v2925_v24, %v2925_v24 }
 0x21b   :  { %v2307_v48 = vpop.f32.mrf.mxu0  ;;  %v2371_v0 = vpop.f32.mrf.mxu1 }
 0x21c   :  { %v2927_v51 = vadd.f32 %v2369_v46, %v1655_v23  ;;  %v2308_v38 = vadd.f32 %v2307_v48, %v2306_v25  ;;  %1788 = vadd.xlane.f32.xlu1 %v2925_v24  ;;  %v2372_v57 = vadd.f32 %v2371_v0, %v2370_v49 }
 0x21d   :  { %v2309_v52 = vpop.f32.mrf.mxu0  ;;  %v2373_v56 = vpop.f32.mrf.mxu1 }
 0x21e   :  { %v1658_v35 = vadd.f32 %v2308_v38, %v2830_v44  ;;  %1790 = vadd.xlane.f32.xlu0 %v2927_v51  ;;  %v1826_v9 = vmul.f32 %v2927_v51, %v2927_v51 }
 0x21f   :  { %v2310_v55 = vpop.f32.mrf.mxu0  ;;  %v2374_v8 = vpop.f32.mrf.mxu1 }
 0x220   :  { %v2311_v3 = vadd.f32 %v2310_v55, %v2309_v52  ;;  %1852 = vadd.xlane.f32.xlu1 %v1825_v5  ;;  %v2938_v58 = vadd.f32 %v2372_v57, %v1658_v35  ;;  %v2375_v44 = vadd.f32 %v2374_v8, %v2373_v56 }
 0x221   :  { %v2312_v10 = vpop.f32.mrf.mxu0  ;;  %v2376_v45 = vpop.f32.mrf.mxu1 }
 0x222   :  { %v1663_v41 = vadd.f32 %v2311_v3, %v1566_v63  ;;  %1854 = vadd.xlane.f32.xlu0 %v1826_v9  ;;  %v1827_v6 = vmul.f32 %v2938_v58, %v2938_v58 }
 0x223   :  { %v2313_v60 = vpop.f32.mrf.mxu0  ;;  %v2377_v34 = vpop.f32.mrf.mxu1 }
 0x224   :  { %v2940_v11 = vadd.f32 %v2375_v44, %v1663_v41  ;;  %v2314_v12 = vadd.f32 %v2313_v60, %v2312_v10  ;;  %1792 = vadd.xlane.f32.xlu1 %v2938_v58  ;;  %v2378_v36 = vadd.f32 %v2377_v34, %v2376_v45 }
 0x226   :  { %v1666_v4 = vadd.f32 %v2314_v12, %v2838_v27  ;;  %1794 = vadd.xlane.f32.xlu0 %v2940_v11  ;;  %v1828_v18 = vmul.f32 %v2940_v11, %v2940_v11 }
 0x228   :  { %1856 = vadd.xlane.f32.xlu1 %v1827_v6  ;;  %v2949_v13 = vadd.f32 %v2378_v36, %v1666_v4 }
 0x22a   :  { %1858 = vadd.xlane.f32.xlu0 %v1828_v18  ;;  %v1829_v16 = vmul.f32 %v2949_v13, %v2949_v13 }
 0x22c   :  { %1796 = vadd.xlane.f32.xlu1 %v2949_v13 }
 0x230   :  { %1860 = vadd.xlane.f32.xlu1 %v1829_v16 }
 0x277   :  { %v1767_v27 = vpop.xlane.xlu0 %1766 }
 0x278   :  { %v1798_v17 = vmul.f32 0.033333335, %v1767_v27 }
 0x27a   :  { %v1878_v28 = vmul.f32 %v1798_v17, %v1798_v17  ;;  %v1926_v60 = vsub.f32 %v2842_v59, %v1798_v17 }
 0x27b   :  { %v1831_v20 = vpop.xlane.xlu0 %1830 }
 0x27c   :  { %v1862_v47 = vmul.f32 0.033333335, %v1831_v20 }
 0x27d   :  { %v1833_v29 = vpop.xlane.xlu1 %1832 }
 0x27e   :  { %v1894_v15 = vsub.f32 %v1862_v47, %v1878_v28  ;;  %v1863_v39 = vmul.f32 0.033333335, %v1833_v29 }
 0x27f   :  { %v1769_v30 = vpop.xlane.xlu0 %1768 }
 0x280   :  { %v1910_v62 = vmax.f32 %v1894_v15, 0.0  ;;  %v1799_v1 = vmul.f32 0.033333335, %v1769_v30 }
 0x281   :  { %v1771_v32 = vpop.xlane.xlu1 %1770 }
 0x282   :  { %v1942_v33 = vadd.f32 1e-05, %v1910_v62  ;;  %v1879_v40 = vmul.f32 %v1799_v1, %v1799_v1  ;;  %v2954_v21 = vmul.f32 0.033333335, %v1771_v32  ;;  %v1927_v15 = vsub.f32 %v2847_v2, %v1799_v1 }
 0x283   :  { %v1835_v19 = vpop.xlane.xlu0 %1834 }
 0x284   :  { %2448 = vrsqrt.f32 %v1942_v33  ;;  %v1895_v26 = vsub.f32 %v1863_v39, %v1879_v40  ;;  %v1880_v25 = vmul.f32 %v2954_v21, %v2954_v21  ;;  %v1864_v23 = vmul.f32 0.033333335, %v1835_v19 }
 0x285   :  { %v1773_v46 = vpop.xlane.xlu1 %1772 }
 0x286   :  { %v1911_v49 = vmax.f32 %v1895_v26, 0.0  ;;  %v2958_v48 = vmul.f32 0.033333335, %v1773_v46  ;;  %v1896_v50 = vsub.f32 %v1864_v23, %v1880_v25  ;;  %v1928_v25 = vsub.f32 %v2854_v22, %v2954_v21 }
 0x287   :  { %v1775_v38 = vpop.xlane.xlu0 %1774 }
 0x288   :  { %v1943_v0 = vadd.f32 1e-05, %v1911_v49  ;;  %v2960_v52 = vmul.f32 0.033333335, %v1775_v38  ;;  %v1912_v31 = vmax.f32 %v1896_v50, 0.0  ;;  %v1881_v56 = vmul.f32 %v2958_v48, %v2958_v48 }
 0x289   :  { %v1837_v35 = vpop.xlane.xlu1 %1836 }
 0x28a   :  { %2450 = vrsqrt.f32 %v1943_v0  ;;  %v1865_v5 = vmul.f32 0.033333335, %v1837_v35  ;;  %v1944_v55 = vadd.f32 1e-05, %v1912_v31  ;;  %v1882_v57 = vmul.f32 %v2960_v52, %v2960_v52 }
 0x28b   :  { %v1839_v63 = vpop.xlane.xlu0 %1838 }
 0x28c   :  { %v1897_v3 = vsub.f32 %v1865_v5, %v1881_v56  ;;  %v1866_v8 = vmul.f32 0.033333335, %v1839_v63  ;;  %2452 = vrsqrt.f32 %v1944_v55  ;;  %v1929_v56 = vsub.f32 %v2865_v61, %v2958_v48 }
 0x28d   :  { %v1777_v9 = vpop.xlane.xlu1 %1776 }
 0x28e   :  { %v1913_v10 = vmax.f32 %v1897_v3, 0.0  ;;  %v1898_v41 = vsub.f32 %v1866_v8, %v1882_v57  ;;  %v2966_v44 = vmul.f32 0.033333335, %v1777_v9  ;;  %v1930_v8 = vsub.f32 %v2867_v53, %v2960_v52 }
 0x28f   :  { %v1779_v45 = vpop.xlane.xlu0 %1778 }
 0x290   :  { %v1945_v12 = vadd.f32 1e-05, %v1913_v10  ;;  %v1914_v34 = vmax.f32 %v1898_v41, 0.0  ;;  %v1883_v6 = vmul.f32 %v2966_v44, %v2966_v44  ;;  %v2971_v36 = vmul.f32 0.033333335, %v1779_v45 }
 0x291   :  { %v2449_v4 = vpop.eup %2448  ;;  %v1841_v18 = vpop.xlane.xlu1 %1840 }
 0x292   :  { %v1974_v16 = vmul.f32 %v2449_v4, %v1926_v60  ;;  %2454 = vrsqrt.f32 %v1945_v12  ;;  %v1946_v27 = vadd.f32 1e-05, %v1914_v34  ;;  %v1867_v20 = vmul.f32 0.033333335, %v1841_v18 }
 0x293   :  { %v1843_v28 = vpop.xlane.xlu0 %1842  ;;  %v1884_v59 = vmul.f32 %v2971_v36, %v2971_v36 }
 0x294   :  { %1990 = vst [vmem:[%s3076_s3] sm:$0xff] %v1974_v16  ;;  %2456 = vrsqrt.f32 %v1946_v27  ;;  %v1899_v17 = vsub.f32 %v1867_v20, %v1883_v6  ;;  %v1868_v47 = vmul.f32 0.033333335, %v1843_v28  ;;  %v1931_v27 = vsub.f32 %v2880_v37, %v2966_v44 }
 0x295   :  { %v1781_v29 = vpop.xlane.xlu1 %1780 }
 0x296   :  { %v1915_v30 = vmax.f32 %v1899_v17, 0.0  ;;  %v1900_v62 = vsub.f32 %v1868_v47, %v1884_v59  ;;  %v2979_v32 = vmul.f32 0.033333335, %v1781_v29  ;;  %v1932_v29 = vsub.f32 %v2882_v43, %v2971_v36 }
 0x297   :  { %v2451_v33 = vpop.eup %2450  ;;  %v1783_v39 = vpop.xlane.xlu0 %1782 }
 0x298   :  { %v1975_v40 = vmul.f32 %v2451_v33, %v1927_v15  ;;  %v1947_v19 = vadd.f32 1e-05, %v1915_v30  ;;  %v1916_v26 = vmax.f32 %v1900_v62, 0.0  ;;  %v2983_v23 = vmul.f32 0.033333335, %v1783_v39 }
 0x299   :  { %v1845_v46 = vpop.xlane.xlu1 %1844  ;;  %v2453_v49 = vpop.eup %2452  ;;  %v1885_v1 = vmul.f32 %v2979_v32, %v2979_v32 }
 0x29a   :  { %1991 = vst [vmem:[%s3076_s3 + $0x8] sm:$0xff] %v1975_v40  ;;  %2458 = vrsqrt.f32 %v1947_v19  ;;  %v1948_v2 = vadd.f32 1e-05, %v1916_v26  ;;  %v1869_v50 = vmul.f32 0.033333335, %v1845_v46  ;;  %v1976_v38 = vmul.f32 %v2453_v49, %v1928_v25 }
 0x29b   :  { %v1847_v0 = vpop.xlane.xlu0 %1846  ;;  %v1886_v22 = vmul.f32 %v2983_v23, %v2983_v23 }
 0x29c   :  { %2460 = vrsqrt.f32 %v1948_v2  ;;  %v1901_v21 = vsub.f32 %v1869_v50, %v1885_v1  ;;  %v1870_v31 = vmul.f32 0.033333335, %v1847_v0  ;;  %1992 = vst [vmem:[%s3076_s3 + $0x10] sm:$0xff] %v1976_v38  ;;  %v1933_v2 = vsub.f32 %v2895_v42, %v2979_v32 }
 0x29d   :  { %v1785_v35 = vpop.xlane.xlu1 %1784 }
 0x29e   :  { %v1917_v5 = vmax.f32 %v1901_v21, 0.0  ;;  %v1902_v55 = vsub.f32 %v1870_v31, %v1886_v22  ;;  %v2997_v63 = vmul.f32 0.033333335, %v1785_v35  ;;  %v1934_v21 = vsub.f32 %v2897_v54, %v2983_v23 }
 0x29f   :  { %v2455_v57 = vpop.eup %2454  ;;  %v1787_v3 = vpop.xlane.xlu0 %1786 }
 0x2a0   :  { %v1977_v9 = vmul.f32 %v2455_v57, %v1929_v56  ;;  %v1949_v10 = vadd.f32 1e-05, %v1917_v5  ;;  %v1918_v41 = vmax.f32 %v1902_v55, 0.0  ;;  %v1887_v60 = vmul.f32 %v2997_v63, %v2997_v63 }
 0x2a1   :  { %v2457_v45 = vpop.eup %2456  ;;  %v3003_v12 = vmul.f32 0.033333335, %v1787_v3  ;;  %v1849_v34 = vpop.xlane.xlu1 %1848 }
 0x2a2   :  { %1993 = vst [vmem:[%s3076_s3 + $0x18] sm:$0xff] %v1977_v9  ;;  %v1978_v61 = vmul.f32 %v2457_v45, %v1930_v8  ;;  %2462 = vrsqrt.f32 %v1949_v10  ;;  %v1950_v48 = vadd.f32 1e-05, %v1918_v41  ;;  %v1871_v4 = vmul.f32 0.033333335, %v1849_v34 }
 0x2a3   :  { %v1851_v6 = vpop.xlane.xlu0 %1850  ;;  %v1888_v53 = vmul.f32 %v3003_v12, %v3003_v12  ;;  %v1935_v45 = vsub.f32 %v2910_v7, %v2997_v63 }
 0x2a4   :  { %1994 = vst [vmem:[%s3076_s3 + $0x20] sm:$0xff] %v1978_v61  ;;  %2464 = vrsqrt.f32 %v1950_v48  ;;  %v1903_v52 = vsub.f32 %v1871_v4, %v1887_v60  ;;  %v1872_v18 = vmul.f32 0.033333335, %v1851_v6  ;;  %v1936_v4 = vsub.f32 %v2912_v14, %v3003_v12 }
 0x2a5   :  { %v1789_v16 = vpop.xlane.xlu1 %1788 }
 0x2a6   :  { %v1919_v20 = vmax.f32 %v1903_v52, 0.0  ;;  %v1904_v28 = vsub.f32 %v1872_v18, %v1888_v53  ;;  %v3015_v59 = vmul.f32 0.033333335, %v1789_v16 }
 0x2a7   :  { %v2459_v17 = vpop.eup %2458  ;;  %v1791_v47 = vpop.xlane.xlu0 %1790 }
 0x2a8   :  { %v1979_v15 = vmul.f32 %v2459_v17, %v1931_v27  ;;  %v1951_v30 = vadd.f32 1e-05, %v1919_v20  ;;  %v1920_v62 = vmax.f32 %v1904_v28, 0.0  ;;  %v1889_v39 = vmul.f32 %v3015_v59, %v3015_v59 }
 0x2a9   :  { %v2461_v33 = vpop.eup %2460  ;;  %v3021_v40 = vmul.f32 0.033333335, %v1791_v47  ;;  %v1853_v19 = vpop.xlane.xlu1 %1852  ;;  %v1937_v12 = vsub.f32 %v2925_v24, %v3015_v59 }
 0x2aa   :  { %1995 = vst [vmem:[%s3076_s3 + $0x28] sm:$0xff] %v1979_v15  ;;  %v1980_v37 = vmul.f32 %v2461_v33, %v1932_v29  ;;  %2466 = vrsqrt.f32 %v1951_v30  ;;  %v1952_v44 = vadd.f32 1e-05, %v1920_v62  ;;  %v1873_v26 = vmul.f32 0.033333335, %v1853_v19 }
 0x2ab   :  { %v1855_v25 = vpop.xlane.xlu0 %1854  ;;  %v1890_v43 = vmul.f32 %v3021_v40, %v3021_v40  ;;  %v1938_v47 = vsub.f32 %v2927_v51, %v3021_v40 }
 0x2ac   :  { %1996 = vst [vmem:[%s3076_s3 + $0x30] sm:$0xff] %v1980_v37  ;;  %2468 = vrsqrt.f32 %v1952_v44  ;;  %v1905_v36 = vsub.f32 %v1873_v26, %v1889_v39  ;;  %v1874_v46 = vmul.f32 0.033333335, %v1855_v25 }
 0x2ad   :  { %v1793_v49 = vpop.xlane.xlu1 %1792 }
 0x2ae   :  { %v1921_v1 = vmax.f32 %v1905_v36, 0.0  ;;  %v1906_v50 = vsub.f32 %v1874_v46, %v1890_v43  ;;  %v1811_v38 = vmul.f32 0.033333335, %v1793_v49 }
 0x2af   :  { %v2463_v0 = vpop.eup %2462  ;;  %v1795_v22 = vpop.xlane.xlu0 %1794 }
 0x2b0   :  { %v1981_v31 = vmul.f32 %v2463_v0, %v1933_v2  ;;  %v1953_v35 = vadd.f32 1e-05, %v1921_v1  ;;  %v1922_v56 = vmax.f32 %v1906_v50, 0.0  ;;  %v1891_v55 = vmul.f32 %v1811_v38, %v1811_v38 }
 0x2b1   :  { %v2465_v5 = vpop.eup %2464  ;;  %v1812_v57 = vmul.f32 0.033333335, %v1795_v22  ;;  %v1857_v3 = vpop.xlane.xlu1 %1856  ;;  %v1939_v24 = vsub.f32 %v2938_v58, %v1811_v38 }
 0x2b2   :  { %1997 = vst [vmem:[%s3076_s3 + $0x38] sm:$0xff] %v1981_v31  ;;  %v1982_v42 = vmul.f32 %v2465_v5, %v1934_v21  ;;  %2470 = vrsqrt.f32 %v1953_v35  ;;  %v1954_v32 = vadd.f32 1e-05, %v1922_v56  ;;  %v1875_v8 = vmul.f32 0.033333335, %v1857_v3 }
 0x2b3   :  { %v1859_v9 = vpop.xlane.xlu0 %1858  ;;  %v1892_v54 = vmul.f32 %v1812_v57, %v1812_v57  ;;  %v1940_v33 = vsub.f32 %v2940_v11, %v1812_v57 }
 0x2b4   :  { %1998 = vst [vmem:[%s3076_s3 + $0x40] sm:$0xff] %v1982_v42  ;;  %2472 = vrsqrt.f32 %v1954_v32  ;;  %v1907_v23 = vsub.f32 %v1875_v8, %v1891_v55  ;;  %v1876_v10 = vmul.f32 0.033333335, %v1859_v9 }
 0x2b5   :  { %v1797_v41 = vpop.xlane.xlu1 %1796 }
 0x2b6   :  { %v1923_v60 = vmax.f32 %v1907_v23, 0.0  ;;  %v1908_v34 = vsub.f32 %v1876_v10, %v1892_v54  ;;  %v1813_v61 = vmul.f32 0.033333335, %v1797_v41 }
 0x2b7   :  { %v2467_v48 = vpop.eup %2466 }
 0x2b8   :  { %v1983_v6 = vmul.f32 %v2467_v48, %v1935_v45  ;;  %v1955_v53 = vadd.f32 1e-05, %v1923_v60  ;;  %v1924_v52 = vmax.f32 %v1908_v34, 0.0  ;;  %v1893_v16 = vmul.f32 %v1813_v61, %v1813_v61 }
 0x2b9   :  { %v2469_v18 = vpop.eup %2468  ;;  %v1861_v27 = vpop.xlane.xlu1 %1860  ;;  %v1941_v19 = vsub.f32 %v2949_v13, %v1813_v61 }
 0x2ba   :  { %1999 = vst [vmem:[%s3076_s3 + $0x48] sm:$0xff] %v1983_v6  ;;  %v1984_v20 = vmul.f32 %v2469_v18, %v1936_v4  ;;  %2474 = vrsqrt.f32 %v1955_v53  ;;  %v1956_v7 = vadd.f32 1e-05, %v1924_v52  ;;  %v1877_v63 = vmul.f32 0.033333335, %v1861_v27 }
 0x2bc   :  { %2000 = vst [vmem:[%s3076_s3 + $0x50] sm:$0xff] %v1984_v20  ;;  %2476 = vrsqrt.f32 %v1956_v7  ;;  %v1909_v14 = vsub.f32 %v1877_v63, %v1893_v16 }
 0x2be   :  { %v1925_v28 = vmax.f32 %v1909_v14, 0.0 }
 0x2bf   :  { %v2471_v17 = vpop.eup %2470 }
 0x2c0   :  { %v1985_v29 = vmul.f32 %v2471_v17, %v1937_v12  ;;  %v1957_v15 = vadd.f32 1e-05, %v1925_v28 }
 0x2c1   :  { %v2473_v30 = vpop.eup %2472 }
 0x2c2   :  { %2001 = vst [vmem:[%s3076_s3 + $0x58] sm:$0xff] %v1985_v29  ;;  %v1986_v62 = vmul.f32 %v2473_v30, %v1938_v47  ;;  %2478 = vrsqrt.f32 %v1957_v15 }
 0x2c4   :  { %2002 = vst [vmem:[%s3076_s3 + $0x60] sm:$0xff] %v1986_v62 }
 0x2c7   :  { %v2475_v59 = vpop.eup %2474 }
 0x2c8   :  { %v1987_v39 = vmul.f32 %v2475_v59, %v1939_v24 }
 0x2c9   :  { %v2477_v51 = vpop.eup %2476 }
 0x2ca   :  { %2003 = vst [vmem:[%s3076_s3 + $0x68] sm:$0xff] %v1987_v39  ;;  %v1988_v40 = vmul.f32 %v2477_v51, %v1940_v33 }
 0x2cc   :  { %2004 = vst [vmem:[%s3076_s3 + $0x70] sm:$0xff] %v1988_v40 }
 0x2cf   :  { %v2479_v37 = vpop.eup %2478 }
 0x2d0   :  { %v1989_v44 = vmul.f32 %v2479_v37, %v1941_v19 }
 0x2d2   :  { %2005 = vst [vmem:[%s3076_s3 + $0x78] sm:$0xff] %v1989_v44 }
 0x2d3   :  { %2010 = vsyncpa [#allocation4], 1 }

</bundles_post_ra>
